<compile_context>
chip_gen: v6e
topology: v6e:2x2x1
jax: 0.10.0
libtpu: 0.0.40
codegen_flags: <defaults>
</compile_context>

<pallas_src>
import functools

import jax
import jax.numpy as jnp
from jax.experimental import pallas as pl
from jax.experimental.pallas import tpu as pltpu


def _swish(x):
    # x * sigmoid(x); exp on EUP, approx reciprocal on EUP -> cheap slots.
    return x * pl.reciprocal(1.0 + jnp.exp(-x), approx=True)


# -----------------------------------------------------------------------------
# Fused Pallas kernel.
# Grid = (B, T): axis 0 = image (parallel), axis 1 = spatial tile (arbitrary).
# -----------------------------------------------------------------------------
def fused_forward_kernel(
    patches_ref,   # [1, TILE_S, 32] bf16  im2col rows of image b, tile t
    w_stem_ref,    # [32, 32]  bf16        stem conv weight (27 rows + zero pad)
    b_stem_ref,    # [1, 32]   f32
    w_head_ref,    # [32, 1280] bf16       1x1 "head" conv -> b0 feature dim
    b_head_ref,    # [1, 1280] f32
    w_fc_ref,      # [1280, 128] f32       efficientnet._fc (Linear(1280, 128))
    b_fc_ref,      # [1, 128]  f32
    har_ref,       # [1, 1, 18] f32        haralick features of image b
    w1f_ref,       # [128, 64] f32         fc1 weight, first 128 input columns
    w1h_ref,       # [18, 64]  f32         fc1 weight, last 18 input columns
    b1_ref,        # [1, 64]   f32
    w2_ref,        # [64, 128] f32         fc2 weight zero-padded from [64, 2]
    b2_ref,        # [1, 128]  f32
    out_ref,       # [1, 1, 128] f32       lane-dense output slab
    acc_ref,       # VMEM scratch [1, 1280] f32   pooled-sum accumulator
    *,
    s_valid,       # static: number of valid spatial positions per image
    s_padded,      # static: padded spatial extent (multiple of tile_s)
):
    f32 = jnp.float32
    bf16 = jnp.bfloat16
    t = pl.program_id(1)

    # ---- init pooled-sum accumulator for this image --------------------------
    @pl.when(t == 0)
    def _():
        acc_ref[...] = jnp.zeros_like(acc_ref)

    # ---- stem conv (im2col matmul, bf16 operands / f32 accumulate) + swish ---
    p = patches_ref[0]                                              # [TILE_S, 32]
    h1 = jnp.dot(p, w_stem_ref[...], preferred_element_type=f32) + b_stem_ref[...]
    h1 = _swish(h1)

    # ---- 1x1 head conv to 1280 features + swish -------------------------------
    h2 = (jnp.dot(h1.astype(bf16), w_head_ref[...],
                  preferred_element_type=f32) + b_head_ref[...])
    h2 = _swish(h2)

    # ---- global average pool: unmasked per-tile row-sum into the accumulator --
    # (zero-padded spatial rows contribute one constant row each; corrected
    #  exactly in the tail instead of masking on the hot path)
    acc_ref[...] += jnp.sum(h2, axis=0, keepdims=True)              # [1, 1280]

    # ---- tail (only on the last spatial tile of this image) -------------------
    @pl.when(t == pl.num_programs(1) - 1)
    def _():
        pooled_sum = acc_ref[...]                                   # [1, 1280]

        if s_padded != s_valid:
            # A zero im2col row yields exactly h1 = swish(b_stem), then the
            # same bf16 cast + head matmul + swish as the main path, so the
            # padded rows' contribution is (count * constant_row).
            pad_h1 = _swish(b_stem_ref[...])                        # [1, 32]
            pad_h2 = (jnp.dot(pad_h1.astype(bf16), w_head_ref[...],
                              preferred_element_type=f32) + b_head_ref[...])
            pad_h2 = _swish(pad_h2)                                 # [1, 1280]
            pooled_sum = pooled_sum - float(s_padded - s_valid) * pad_h2

        pooled = pooled_sum * (1.0 / float(s_valid))                # [1, 1280]

        # efficientnet._fc : 1280 -> 128
        feat = (jnp.dot(pooled, w_fc_ref[...], preferred_element_type=f32)
                + b_fc_ref[...])                                    # [1, 128]

        # torch.cat((feat, haralick), dim=1) then fc1, expressed as two matmuls.
        har = har_ref[0]                                            # [1, 18]
        z1 = (jnp.dot(feat, w1f_ref[...], preferred_element_type=f32)
              + jnp.dot(har, w1h_ref[...], preferred_element_type=f32)
              + b1_ref[...])
        z1 = jnp.maximum(z1, 0.0)                                   # ReLU

        # fc2 : 64 -> 2 (weight padded to 128 lanes for an unmasked store).
        out_ref[0] = (jnp.dot(z1, w2_ref[...], preferred_element_type=f32)
                      + b2_ref[...])                                # [1, 128]


# -----------------------------------------------------------------------------
# JAX glue: layout conversion, TF-SAME padding, im2col, parameter setup.
# -----------------------------------------------------------------------------
def im2col_stride2_same(x_nhwc):
    """3x3 stride-2 static-SAME im2col. Returns ([B, OH*OW, 9*C], OH, OW)."""
    B, H, W, C = x_nhwc.shape
    OH, OW = (H + 1) // 2, (W + 1) // 2
    pad_h = max((OH - 1) * 2 + 3 - H, 0)
    pad_w = max((OW - 1) * 2 + 3 - W, 0)
    # Static-SAME splits padding: pad//2 before, remainder after.
    x = jnp.pad(x_nhwc, ((0, 0),
                         (pad_h // 2, pad_h - pad_h // 2),
                         (pad_w // 2, pad_w - pad_w // 2),
                         (0, 0)))
    cols = []
    for i in range(3):
        for j in range(3):
            cols.append(x[:, i:i + 2 * OH:2, j:j + 2 * OW:2, :])    # [B, OH, OW, C]
    patches = jnp.stack(cols, axis=-2)                              # [B, OH, OW, 9, C]
    return patches.reshape(B, OH * OW, 9 * C), OH, OW


def init_params(key):
    def lin(k, fan_in, fan_out):
        kw, kb = jax.random.split(k)
        w = jax.random.normal(kw, (fan_in, fan_out), jnp.float32) / jnp.sqrt(
            jnp.float32(fan_in))
        b = 0.01 * jax.random.normal(kb, (1, fan_out), jnp.float32)
        return w, b

    ks = jax.random.split(key, 6)
    p = {}
    p["w_stem"], p["b_stem"] = lin(ks[0], 27, 32)        # 3x3x3 -> 32 stem conv
    p["w_head"], p["b_head"] = lin(ks[1], 32, 1280)      # 1x1 conv to b0 feature dim
    p["w_fc"], p["b_fc"] = lin(ks[2], 1280, 128)         # efficientnet._fc
    p["w1f"], p["b1"] = lin(ks[3], 128, 64)              # fc1 (feature half)
    p["w1h"], _ = lin(ks[4], 18, 64)                     # fc1 (haralick half)
    p["w2"], p["b2"] = lin(ks[5], 64, 2)                 # fc2
    return p


def _round_up(a, m):
    return (a + m - 1) // m * m


def _resident_spec(arr):
    """Full-array block, same block index every grid step (stays VMEM-resident)."""
    zeros = (0,) * arr.ndim
    return pl.BlockSpec(arr.shape, lambda b, t, _z=zeros: _z)


def efficientnet_haralick_forward(x_nchw, haralick, params, *, tile_s_max=1024):
    f32, bf16 = jnp.float32, jnp.bfloat16
    B = x_nchw.shape[0]

    x_nhwc = jnp.transpose(x_nchw, (0, 2, 3, 1)).astype(f32)
    patches, OH, OW = im2col_stride2_same(x_nhwc)                   # [B, S, 27]
    S = OH * OW

    # Spatial tiling: cap at 1024 rows (fits v7x 64 MiB VMEM comfortably),
    # pad S up to a multiple of the tile; padded rows are corrected exactly
    # in the kernel tail.
    tile_s = min(tile_s_max, _round_up(S, 8))
    s_pad = _round_up(S, tile_s)
    n_t = s_pad // tile_s

    # Pad patch features 27 -> 32 and spatial S -> s_pad; cast to bf16.
    patches = jnp.pad(patches, ((0, 0), (0, s_pad - S),
                                (0, 32 - patches.shape[-1]))).astype(bf16)

    w_stem = jnp.pad(params["w_stem"], ((0, 5), (0, 0))).astype(bf16)   # [32, 32]
    w_head = params["w_head"].astype(bf16)                              # [32, 1280]
    w2_pad = jnp.pad(params["w2"], ((0, 0), (0, 126)))                  # [64, 128]
    b2_pad = jnp.pad(params["b2"], ((0, 0), (0, 126)))                  # [1, 128]
    har3 = haralick.astype(f32).reshape(B, 1, 18)

    inputs = (
        patches,
        w_stem, params["b_stem"],
        w_head, params["b_head"],
        params["w_fc"], params["b_fc"],
        har3,
        params["w1f"], params["w1h"], params["b1"],
        w2_pad, b2_pad,
    )

    in_specs = [pl.BlockSpec((1, tile_s, 32), lambda b, t: (b, t, 0))]
    for arr in inputs[1:7]:
        in_specs.append(_resident_spec(arr))
    in_specs.append(pl.BlockSpec((1, 1, 18), lambda b, t: (b, 0, 0)))   # haralick row
    for arr in inputs[8:]:
        in_specs.append(_resident_spec(arr))

    kernel = functools.partial(fused_forward_kernel, s_valid=S, s_padded=s_pad)

    n_rows = B * S
    cost = pl.CostEstimate(
        flops=int(2 * n_rows * 32 * 32 + 2 * n_rows * 32 * 1280
                  + 2 * n_rows * 1280                                 # pooled row-sum
                  + 2 * B * (1280 * 128 + 128 * 64 + 18 * 64 + 64 * 128)),
        transcendentals=int(n_rows * (32 + 1280)),
        bytes_accessed=int(patches.size * 2 + (w_stem.size + w_head.size) * 2
                           + (params["w_fc"].size + params["w1f"].size
                              + params["w1h"].size + w2_pad.size) * 4
                           + B * (18 + 128) * 4),
    )

    out = pl.pallas_call(
        kernel,
        out_shape=jax.ShapeDtypeStruct((B, 1, 128), f32),
        grid_spec=pltpu.PrefetchScalarGridSpec(
            num_scalar_prefetch=0,
            grid=(B, n_t),
            in_specs=in_specs,
            out_specs=pl.BlockSpec((1, 1, 128), lambda b, t: (b, 0, 0)),
            scratch_shapes=[pltpu.VMEM((1, 1280), jnp.float32)],
        ),
        compiler_params=pltpu.CompilerParams(
            dimension_semantics=("parallel", "arbitrary"),
            vmem_limit_bytes=48 * 1024 * 1024,
        ),
        cost_estimate=cost,
    )(*inputs)

    return out.reshape(B, 128)[:, :2]


if __name__ == "__main__":
    key = jax.random.PRNGKey(0)
    k_x, k_h, k_p = jax.random.split(key, 3)

    # Small shapes consistent with the module: NCHW image + 18 haralick features.
    x = jax.random.normal(k_x, (2, 3, 16, 16), jnp.float32)
    haralick = jax.random.normal(k_h, (2, 18), jnp.float32)

    params = init_params(k_p)

    out = efficientnet_haralick_forward(x, haralick, params)
    out = jax.block_until_ready(out)
    assert out.shape == (2, 2) and out.dtype == jnp.float32
    print("KERNEL_OK")
</pallas_src>

<mosaic_0001>
module attributes {stable_mosaic.version = 11 : i64} {
  func.func @fused_forward_kernel(%arg0: i32, %arg1: i32, %arg2: memref<1x64x32xbf16, #tpu.memory_space<vmem>>, %arg3: memref<32x32xbf16, #tpu.memory_space<vmem>>, %arg4: memref<1x32xf32, #tpu.memory_space<vmem>>, %arg5: memref<32x1280xbf16, #tpu.memory_space<vmem>>, %arg6: memref<1x1280xf32, #tpu.memory_space<vmem>>, %arg7: memref<1280x128xf32, #tpu.memory_space<vmem>>, %arg8: memref<1x128xf32, #tpu.memory_space<vmem>>, %arg9: memref<1x1x18xf32, #tpu.memory_space<vmem>>, %arg10: memref<128x64xf32, #tpu.memory_space<vmem>>, %arg11: memref<18x64xf32, #tpu.memory_space<vmem>>, %arg12: memref<1x64xf32, #tpu.memory_space<vmem>>, %arg13: memref<64x128xf32, #tpu.memory_space<vmem>>, %arg14: memref<1x128xf32, #tpu.memory_space<vmem>>, %arg15: memref<1x1x128xf32, #tpu.memory_space<vmem>>, %arg16: memref<1x1280xf32, #tpu.memory_space<vmem>>) attributes {dimension_semantics = [#tpu.dimension_semantics<parallel>, #tpu.dimension_semantics<arbitrary>], iteration_bounds = array<i64: 2, 1>, scalar_prefetch = 0 : i64, scratch_operands = 1 : i64, tpu.core_type = #tpu.core_type<tc>, window_params = [{transform_indices = @transform_0, window_bounds = array<i64: 1, 64, 32>}, {pipeline_mode = #tpu.pipeline_mode<synchronous>, transform_indices = @transform_1, window_bounds = array<i64: 32, 32>}, {pipeline_mode = #tpu.pipeline_mode<synchronous>, transform_indices = @transform_2, window_bounds = array<i64: 1, 32>}, {pipeline_mode = #tpu.pipeline_mode<synchronous>, transform_indices = @transform_3, window_bounds = array<i64: 32, 1280>}, {pipeline_mode = #tpu.pipeline_mode<synchronous>, transform_indices = @transform_4, window_bounds = array<i64: 1, 1280>}, {pipeline_mode = #tpu.pipeline_mode<synchronous>, transform_indices = @transform_5, window_bounds = array<i64: 1280, 128>}, {pipeline_mode = #tpu.pipeline_mode<synchronous>, transform_indices = @transform_6, window_bounds = array<i64: 1, 128>}, {transform_indices = @transform_7, window_bounds = array<i64: 1, 1, 18>}, {pipeline_mode = #tpu.pipeline_mode<synchronous>, transform_indices = @transform_8, window_bounds = array<i64: 128, 64>}, {pipeline_mode = #tpu.pipeline_mode<synchronous>, transform_indices = @transform_9, window_bounds = array<i64: 18, 64>}, {pipeline_mode = #tpu.pipeline_mode<synchronous>, transform_indices = @transform_10, window_bounds = array<i64: 1, 64>}, {pipeline_mode = #tpu.pipeline_mode<synchronous>, transform_indices = @transform_11, window_bounds = array<i64: 64, 128>}, {pipeline_mode = #tpu.pipeline_mode<synchronous>, transform_indices = @transform_12, window_bounds = array<i64: 1, 128>}, {transform_indices = @transform_13, window_bounds = array<i64: 1, 1, 128>}]} {
    %c0_i32 = arith.constant 0 : i32
    %0 = arith.cmpi eq, %arg1, %c0_i32 : i32
    %1 = arith.extui %0 : i1 to i32
    %c0_i32_0 = arith.constant 0 : i32
    %2 = arith.cmpi ne, %1, %c0_i32_0 : i32
    scf.if %2 {
      %cst_23 = arith.constant 0.000000e+00 : f32
      %38 = vector.broadcast %cst_23 : f32 to vector<1x1280xf32>
      %c0_24 = arith.constant 0 : index
      %c0_25 = arith.constant 0 : index
      %39 = vector.load %arg16[%c0_24, %c0_25] : memref<1x1280xf32, #tpu.memory_space<vmem>>, vector<1x1280xf32>
      tpu.vector_store %arg16[%c0_24, %c0_25], %38 {strides = array<i32>} : memref<1x1280xf32, #tpu.memory_space<vmem>>, vector<1x1280xf32>,
    } else {
    }
    %c0 = arith.constant 0 : index
    %c0_1 = arith.constant 0 : index
    %c0_2 = arith.constant 0 : index
    %3 = vector.load %arg2[%c0, %c0_1, %c0_2] : memref<1x64x32xbf16, #tpu.memory_space<vmem>>, vector<1x64x32xbf16>
    %4 = vector.shape_cast %3 : vector<1x64x32xbf16> to vector<64x32xbf16>
    %c0_3 = arith.constant 0 : index
    %c0_4 = arith.constant 0 : index
    %5 = vector.load %arg3[%c0_3, %c0_4] : memref<32x32xbf16, #tpu.memory_space<vmem>>, vector<32x32xbf16>
    %cst = arith.constant dense<0.000000e+00> : vector<64x32xf32>
    %6 = tpu.matmul %4, %5, %cst {dimension_numbers = #tpu.dot_dimension_numbers<[1], [0], [0], [1], [0, 0, 1, 1], [], []>} : vector<64x32xbf16>, vector<32x32xbf16>, vector<64x32xf32> -> vector<64x32xf32>
    %c0_5 = arith.constant 0 : index
    %c0_6 = arith.constant 0 : index
    %7 = vector.load %arg4[%c0_5, %c0_6] : memref<1x32xf32, #tpu.memory_space<vmem>>, vector<1x32xf32>
    %8 = vector.broadcast %7 : vector<1x32xf32> to vector<64x32xf32>
    %9 = arith.addf %6, %8 : vector<64x32xf32>
    %cst_7 = arith.constant 0.000000e+00 : f32
    %10 = vector.broadcast %cst_7 : f32 to vector<64x32xf32>
    %11 = arith.subf %10, %9 : vector<64x32xf32>
    %12 = math.exp %11 : vector<64x32xf32>
    %cst_8 = arith.constant 1.000000e+00 : f32
    %13 = vector.broadcast %cst_8 : f32 to vector<64x32xf32>
    %14 = arith.addf %13, %12 : vector<64x32xf32>
    %15 = tpu.reciprocal %14 {approx = true} : vector<64x32xf32> -> vector<64x32xf32>
    %16 = arith.mulf %9, %15 : vector<64x32xf32>
    %17 = arith.truncf %16 : vector<64x32xf32> to vector<64x32xbf16>
    %c0_9 = arith.constant 0 : index
    %c0_10 = arith.constant 0 : index
    %18 = vector.load %arg5[%c0_9, %c0_10] : memref<32x1280xbf16, #tpu.memory_space<vmem>>, vector<32x1280xbf16>
    %cst_11 = arith.constant dense<0.000000e+00> : vector<64x1280xf32>
    %19 = tpu.matmul %17, %18, %cst_11 {dimension_numbers = #tpu.dot_dimension_numbers<[1], [0], [0], [1], [0, 0, 1, 1], [], []>} : vector<64x32xbf16>, vector<32x1280xbf16>, vector<64x1280xf32> -> vector<64x1280xf32>
    %c0_12 = arith.constant 0 : index
    %c0_13 = arith.constant 0 : index
    %20 = vector.load %arg6[%c0_12, %c0_13] : memref<1x1280xf32, #tpu.memory_space<vmem>>, vector<1x1280xf32>
    %21 = vector.broadcast %20 : vector<1x1280xf32> to vector<64x1280xf32>
    %22 = arith.addf %19, %21 : vector<64x1280xf32>
    %cst_14 = arith.constant 0.000000e+00 : f32
    %23 = vector.broadcast %cst_14 : f32 to vector<64x1280xf32>
    %24 = arith.subf %23, %22 : vector<64x1280xf32>
    %25 = math.exp %24 : vector<64x1280xf32>
    %cst_15 = arith.constant 1.000000e+00 : f32
    %26 = vector.broadcast %cst_15 : f32 to vector<64x1280xf32>
    %27 = arith.addf %26, %25 : vector<64x1280xf32>
    %28 = tpu.reciprocal %27 {approx = true} : vector<64x1280xf32> -> vector<64x1280xf32>
    %29 = arith.mulf %22, %28 : vector<64x1280xf32>
    %c0_16 = arith.constant 0 : index
    %c0_17 = arith.constant 0 : index
    %30 = vector.load %arg16[%c0_16, %c0_17] : memref<1x1280xf32, #tpu.memory_space<vmem>>, vector<1x1280xf32>
    %cst_18 = arith.constant dense<0.000000e+00> : vector<1280xf32>
    %31 = vector.multi_reduction <add>, %29, %cst_18 [0] : vector<64x1280xf32> to vector<1280xf32>
    %32 = vector.shape_cast %31 : vector<1280xf32> to vector<1x1280xf32>
    %33 = arith.addf %30, %32 : vector<1x1280xf32>
    %c0_19 = arith.constant 0 : index
    %c0_20 = arith.constant 0 : index
    %34 = vector.load %arg16[%c0_19, %c0_20] : memref<1x1280xf32, #tpu.memory_space<vmem>>, vector<1x1280xf32>
    tpu.vector_store %arg16[%c0_19, %c0_20], %33 {strides = array<i32>} : memref<1x1280xf32, #tpu.memory_space<vmem>>, vector<1x1280xf32>,
    %c0_i32_21 = arith.constant 0 : i32
    %35 = arith.cmpi eq, %arg1, %c0_i32_21 : i32
    %36 = arith.extui %35 : i1 to i32
    %c0_i32_22 = arith.constant 0 : i32
    %37 = arith.cmpi ne, %36, %c0_i32_22 : i32
    scf.if %37 {
      %c0_23 = arith.constant 0 : index
      %c0_24 = arith.constant 0 : index
      %38 = vector.load %arg16[%c0_23, %c0_24] : memref<1x1280xf32, #tpu.memory_space<vmem>>, vector<1x1280xf32>
      %cst_25 = arith.constant 1.562500e-02 : f32
      %39 = vector.broadcast %cst_25 : f32 to vector<1x1280xf32>
      %40 = arith.mulf %38, %39 : vector<1x1280xf32>
      %c0_26 = arith.constant 0 : index
      %c0_27 = arith.constant 0 : index
      %41 = vector.load %arg7[%c0_26, %c0_27] : memref<1280x128xf32, #tpu.memory_space<vmem>>, vector<1280x128xf32>
      %cst_28 = arith.constant dense<0.000000e+00> : vector<1x128xf32>
      %42 = tpu.matmul %40, %41, %cst_28 {dimension_numbers = #tpu.dot_dimension_numbers<[1], [0], [0], [1], [0, 0, 1, 1], [], []>} : vector<1x1280xf32>, vector<1280x128xf32>, vector<1x128xf32> -> vector<1x128xf32>
      %c0_29 = arith.constant 0 : index
      %c0_30 = arith.constant 0 : index
      %43 = vector.load %arg8[%c0_29, %c0_30] : memref<1x128xf32, #tpu.memory_space<vmem>>, vector<1x128xf32>
      %44 = arith.addf %42, %43 : vector<1x128xf32>
      %c0_31 = arith.constant 0 : index
      %c0_32 = arith.constant 0 : index
      %c0_33 = arith.constant 0 : index
      %45 = vector.load %arg9[%c0_31, %c0_32, %c0_33] : memref<1x1x18xf32, #tpu.memory_space<vmem>>, vector<1x1x18xf32>
      %46 = vector.shape_cast %45 : vector<1x1x18xf32> to vector<1x18xf32>
      %c0_34 = arith.constant 0 : index
      %c0_35 = arith.constant 0 : index
      %47 = vector.load %arg10[%c0_34, %c0_35] : memref<128x64xf32, #tpu.memory_space<vmem>>, vector<128x64xf32>
      %cst_36 = arith.constant dense<0.000000e+00> : vector<1x64xf32>
      %48 = tpu.matmul %44, %47, %cst_36 {dimension_numbers = #tpu.dot_dimension_numbers<[1], [0], [0], [1], [0, 0, 1, 1], [], []>} : vector<1x128xf32>, vector<128x64xf32>, vector<1x64xf32> -> vector<1x64xf32>
      %c0_37 = arith.constant 0 : index
      %c0_38 = arith.constant 0 : index
      %49 = vector.load %arg11[%c0_37, %c0_38] : memref<18x64xf32, #tpu.memory_space<vmem>>, vector<18x64xf32>
      %cst_39 = arith.constant dense<0.000000e+00> : vector<1x64xf32>
      %50 = tpu.matmul %46, %49, %cst_39 {dimension_numbers = #tpu.dot_dimension_numbers<[1], [0], [0], [1], [0, 0, 1, 1], [], []>} : vector<1x18xf32>, vector<18x64xf32>, vector<1x64xf32> -> vector<1x64xf32>
      %51 = arith.addf %48, %50 : vector<1x64xf32>
      %c0_40 = arith.constant 0 : index
      %c0_41 = arith.constant 0 : index
      %52 = vector.load %arg12[%c0_40, %c0_41] : memref<1x64xf32, #tpu.memory_space<vmem>>, vector<1x64xf32>
      %53 = arith.addf %51, %52 : vector<1x64xf32>
      %cst_42 = arith.constant 0.000000e+00 : f32
      %54 = vector.broadcast %cst_42 : f32 to vector<1x64xf32>
      %55 = arith.maximumf %53, %54 : vector<1x64xf32>
      %c0_43 = arith.constant 0 : index
      %c0_44 = arith.constant 0 : index
      %56 = vector.load %arg13[%c0_43, %c0_44] : memref<64x128xf32, #tpu.memory_space<vmem>>, vector<64x128xf32>
      %cst_45 = arith.constant dense<0.000000e+00> : vector<1x128xf32>
      %57 = tpu.matmul %55, %56, %cst_45 {dimension_numbers = #tpu.dot_dimension_numbers<[1], [0], [0], [1], [0, 0, 1, 1], [], []>} : vector<1x64xf32>, vector<64x128xf32>, vector<1x128xf32> -> vector<1x128xf32>
      %c0_46 = arith.constant 0 : index
      %c0_47 = arith.constant 0 : index
      %58 = vector.load %arg14[%c0_46, %c0_47] : memref<1x128xf32, #tpu.memory_space<vmem>>, vector<1x128xf32>
      %59 = arith.addf %57, %58 : vector<1x128xf32>
      %c0_48 = arith.constant 0 : index
      %c0_49 = arith.constant 0 : index
      %c0_50 = arith.constant 0 : index
      %60 = vector.load %arg15[%c0_48, %c0_49, %c0_50] : memref<1x1x128xf32, #tpu.memory_space<vmem>>, vector<1x1x128xf32>
      %61 = vector.shape_cast %60 : vector<1x1x128xf32> to vector<1x128xf32>
      %62 = vector.shape_cast %59 : vector<1x128xf32> to vector<1x1x128xf32>
      tpu.vector_store %arg15[%c0_48, %c0_49, %c0_50], %62 {strides = array<i32>} : memref<1x1x128xf32, #tpu.memory_space<vmem>>, vector<1x1x128xf32>,
    } else {
    }
    return
  }
  func.func @transform_0(%arg0: i32, %arg1: i32) -> (i32, i32, i32) {
    %c0_i32 = arith.constant 0 : i32
    %c0_i32_0 = arith.constant 0 : i32
    return %arg0, %arg1, %c0_i32 : i32, i32, i32
  }
  func.func @transform_1(%arg0: i32, %arg1: i32) -> (i32, i32) {
    %c0_i32 = arith.constant 0 : i32
    %c0_i32_0 = arith.constant 0 : i32
    %c0_i32_1 = arith.constant 0 : i32
    return %c0_i32, %c0_i32_0 : i32, i32
  }
  func.func @transform_2(%arg0: i32, %arg1: i32) -> (i32, i32) {
    %c0_i32 = arith.constant 0 : i32
    %c0_i32_0 = arith.constant 0 : i32
    %c0_i32_1 = arith.constant 0 : i32
    return %c0_i32, %c0_i32_0 : i32, i32
  }
  func.func @transform_3(%arg0: i32, %arg1: i32) -> (i32, i32) {
    %c0_i32 = arith.constant 0 : i32
    %c0_i32_0 = arith.constant 0 : i32
    %c0_i32_1 = arith.constant 0 : i32
    return %c0_i32, %c0_i32_0 : i32, i32
  }
  func.func @transform_4(%arg0: i32, %arg1: i32) -> (i32, i32) {
    %c0_i32 = arith.constant 0 : i32
    %c0_i32_0 = arith.constant 0 : i32
    %c0_i32_1 = arith.constant 0 : i32
    return %c0_i32, %c0_i32_0 : i32, i32
  }
  func.func @transform_5(%arg0: i32, %arg1: i32) -> (i32, i32) {
    %c0_i32 = arith.constant 0 : i32
    %c0_i32_0 = arith.constant 0 : i32
    %c0_i32_1 = arith.constant 0 : i32
    return %c0_i32, %c0_i32_0 : i32, i32
  }
  func.func @transform_6(%arg0: i32, %arg1: i32) -> (i32, i32) {
    %c0_i32 = arith.constant 0 : i32
    %c0_i32_0 = arith.constant 0 : i32
    %c0_i32_1 = arith.constant 0 : i32
    return %c0_i32, %c0_i32_0 : i32, i32
  }
  func.func @transform_7(%arg0: i32, %arg1: i32) -> (i32, i32, i32) {
    %c0_i32 = arith.constant 0 : i32
    %c0_i32_0 = arith.constant 0 : i32
    %c0_i32_1 = arith.constant 0 : i32
    return %arg0, %c0_i32, %c0_i32_0 : i32, i32, i32
  }
  func.func @transform_8(%arg0: i32, %arg1: i32) -> (i32, i32) {
    %c0_i32 = arith.constant 0 : i32
    %c0_i32_0 = arith.constant 0 : i32
    %c0_i32_1 = arith.constant 0 : i32
    return %c0_i32, %c0_i32_0 : i32, i32
  }
  func.func @transform_9(%arg0: i32, %arg1: i32) -> (i32, i32) {
    %c0_i32 = arith.constant 0 : i32
    %c0_i32_0 = arith.constant 0 : i32
    %c0_i32_1 = arith.constant 0 : i32
    return %c0_i32, %c0_i32_0 : i32, i32
  }
  func.func @transform_10(%arg0: i32, %arg1: i32) -> (i32, i32) {
    %c0_i32 = arith.constant 0 : i32
    %c0_i32_0 = arith.constant 0 : i32
    %c0_i32_1 = arith.constant 0 : i32
    return %c0_i32, %c0_i32_0 : i32, i32
  }
  func.func @transform_11(%arg0: i32, %arg1: i32) -> (i32, i32) {
    %c0_i32 = arith.constant 0 : i32
    %c0_i32_0 = arith.constant 0 : i32
    %c0_i32_1 = arith.constant 0 : i32
    return %c0_i32, %c0_i32_0 : i32, i32
  }
  func.func @transform_12(%arg0: i32, %arg1: i32) -> (i32, i32) {
    %c0_i32 = arith.constant 0 : i32
    %c0_i32_0 = arith.constant 0 : i32
    %c0_i32_1 = arith.constant 0 : i32
    return %c0_i32, %c0_i32_0 : i32, i32
  }
  func.func @transform_13(%arg0: i32, %arg1: i32) -> (i32, i32, i32) {
    %c0_i32 = arith.constant 0 : i32
    %c0_i32_0 = arith.constant 0 : i32
    %c0_i32_1 = arith.constant 0 : i32
    return %arg0, %c0_i32, %c0_i32_0 : i32, i32, i32
  }
}

</mosaic_0001>

<bundles_post_ra>
// kernel: tpu_custom_call.1
= control target key start
LH: loop header
LB: loop body
LE: loop exit
PB: predicated region body
PF: predicated region fallthrough
CT: control target
= control target key end

     0   :  { %18 = vsyncpa [#allocation4], 0  ;;  %s5171_s0 = inlined_call_operand.vmem [shape: bf16[2,64,32], index: 0, kind: input, shape index: {}]   ;;  %s5172_s1 = inlined_call_operand.hbm [shape: bf16[32,32], index: 1, kind: input, shape index: {}]   ;;  %s5173_s2 = inlined_call_operand.vmem [shape: f32[1,32], index: 2, kind: input, shape index: {}]   ;;  %s5174_s3 = inlined_call_operand.vmem [shape: bf16[32,1280], index: 3, kind: input, shape index: {}]   ;;  %s5175_s4 = inlined_call_operand.vmem [shape: f32[1,1280], index: 4, kind: input, shape index: {}]   ;;  %s5176_s5 = inlined_call_operand.hbm [shape: f32[1280,128], index: 5, kind: input, shape index: {}]   ;;  %s5177_s6 = inlined_call_operand.vmem [shape: f32[1,128], index: 6, kind: input, shape index: {}]   ;;  %s5178_s7 = inlined_call_operand.vmem [shape: f32[2,1,18], index: 7, kind: input, shape index: {}]   ;;  %s5179_s8 = inlined_call_operand.vmem [shape: f32[128,64], index: 8, kind: input, shape index: {}]   ;;  %s5180_s9 = inlined_call_operand.hbm [shape: f32[18,64], index: 9, kind: input, shape index: {}]   ;;  %s5181_s10 = inlined_call_operand.vmem [shape: f32[1,64], index: 10, kind: input, shape index: {}]   ;;  %s5182_s11 = inlined_call_operand.vmem [shape: f32[64,128], index: 11, kind: input, shape index: {}]   ;;  %s5183_s12 = inlined_call_operand.vmem [shape: f32[1,128], index: 12, kind: input, shape index: {}]   ;;  %s5184_s13 = inlined_call_operand.hbm [shape: f32[2,1,128], index: 13, kind: output, shape index: {}]  }
   0x1   :  { %19 = vsyncpa [#allocation7], 0 }
   0x2   :  { %20 = vsyncpa [#allocation5], 0 }
   0x3   :  { %22 = vsyncpa [#allocation5 + $0x1], 0  ;;  %s3995_s25 = smov 0   ;;  %s3997_s26 = smov 0  }
   0x4   :  { %s3999_s27 = smov 0   ;;  %s4001_s28 = smov 0  }
   0x5   :  { %s4003_s29 = smov 0   ;;  %s4005_s30 = smov 0  }
   0x6 LB: > { %5233 = sst [smem:[#allocation13_spill]] %s3891_s25  ;;  %s2910_s14 = sadd.s32 4294967295, %s3911_s30   ;;  %s3911_s30 = sphi %s4005_s30, %s28_s30   ;;  %s3907_s29 = sphi %s4003_s29, %s5337_s29   ;;  %s3903_s28 = sphi %s4001_s28, %s5336_s28   ;;  %s3899_s27 = sphi %s3999_s27, %s5335_s27   ;;  %s3895_s26 = sphi %s3997_s26, %s5339_s26   ;;  %s3891_s25 = sphi %s3995_s25, %s5338_s25  }
   0x7   : > { %5234 = sst [smem:[#allocation14_spill]] %s3899_s27  ;;  %s2911_s15 = sadd.s32 4294967294, %s3911_s30  }
   0x8   : > { %5235 = sst [smem:[#allocation15_spill]] %s3907_s29  ;;  %s40_s16 = sadd.s32 1, %s3907_s29 }
   0x9   : > { %s332_s17 = sadd.s32 1, %s3899_s27  ;;  %p42_p0 = scmp.ge.s32.totalorder %s40_s16, 2 }
   0xa   : > { %p342_p1 = scmp.ne.s32.totalorder %s3899_s27, %s3895_s26  ;;  %p343_p2 = scmp.eq.s32.totalorder %s2910_s14, 1 }
   0xb   : > { %p348_p3 = scmp.ne.s32.totalorder %s3895_s26, %s3891_s25  ;;  %s5341_s16 = smov (%p42_p0, %s40_s16), 0 }
   0xc   : > { %5236 = sst [smem:[#allocation16_spill]] %s5341_s16  ;;  %p4035_p4 = por %p343_p2, %p342_p1 }
   0xd   : > { %p349_p5 = scmp.eq.s32.totalorder %s2911_s15, 1  ;;  %s329_s19 = ssub.s32 %s3907_s29, %s5341_s16 }
   0xe   : > { %p2912_p6 = scmp.ge.s32.totalorder %s3911_s30, 1  ;;  %p330_p7 = scmp.eq.s32.totalorder %s329_s19, 0 }
   0xf   : > { %p4042_p8 = por %p349_p5, %p348_p3  ;;  %p356_p9 = scmp.lt.s32.totalorder %s3911_s30, 3 }
  0x10   : > { %s4048_s21 = scalar_select %p330_p7, %s3899_s27, %s332_s17  }
  0x11   : > { %s5238_s20 = scalar_select %p4042_p8, 1, 0 }
  0x12   : > { %5240 = sst [smem:[#allocation18_spill]] %s4048_s21  ;;  %p4050_p10 = pnand %p2912_p6, %p356_p9 }
  0x13   : > { %5239 = sst [smem:[#allocation17_spill]] %s5238_s20  ;;  %p4054_p11 = scmp.eq.s32.totalorder %s2910_s14, 0 }
  0x14   : > { %p3281_p12 = pneg %p4050_p10  ;;  %s3913_s24 = smov [#allocation6]  }
  0x15   : > { %s390_s15 = sshll.u32 %s3913_s24, 4  ;;  %s3914_s17 = smov [#allocation3]   ;;  %s391_s15 = int_to_ptr.vmem [resolvable:$true] %s390_s15 }
  0x16   : > { %p4062_p13 = pnand %p4054_p11, %p3281_p12  ;;  %s368_s16 = sshll.u32 %s3914_s17, 4  ;;  %s369_s16 = int_to_ptr.vmem [resolvable:$true] %s368_s16 }
  0x17   : > { %s3760_s14 = scalar_lea.vmem %s391_s15, 20480  ;;  %p3768_p5 = scmp.lt.s32.totalorder %s391_s15, %s391_s15 }
  0x18   : > { %p3751_p0 = pneg %p4062_p13  ;;  %p3761_p1 = scmp.ne.s32.totalorder %s391_s15, %s3760_s14 }
  0x19   : > { %p3769_p6 = scmp.lt.s32.totalorder %s3760_s14, %s3760_s14 }
  0x1a   : > { %p3763_p2 = pnand %p3761_p1, %p3751_p0 }
  0x1b   : > { %p3770_p7 = por %p3769_p6, %p3768_p5 }
  0x1c   : > { %p3764_p3 = pneg %p3763_p2 }
  0x1e   : > { %p3771_p9 = pnand %p3770_p7, %p3764_p3 }
  0x20   : > { %3774 = shalt.err (!%p3771_p9)
}
  0x21   : > { %s5190_s24 = smov 128   ;;  %s3916_s29 = smov 8  }
  0x22   : > { %3287 = dma.hbm_to_vmem [thread:$0]  (!%p4062_p13), %s5176_s5, 20480, %s391_s15, [#allocation7], %s5190_s24, %s5190_s24, %s3916_s29  }
  0x23   : > { %s3786_s27 = scalar_lea.vmem %s369_s16, 256  ;;  %p3794_p3 = scmp.lt.s32.totalorder %s369_s16, %s369_s16 }
  0x24   : > { %p3787_p12 = scmp.ne.s32.totalorder %s369_s16, %s3786_s27  ;;  %p3795_p5 = scmp.lt.s32.totalorder %s3786_s27, %s3786_s27 }
  0x26   : > { %p3789_p1 = pnand %p3787_p12, %p3751_p0  ;;  %p3796_p6 = por %p3795_p5, %p3794_p3 }
  0x28   : > { %p3790_p2 = pneg %p3789_p1 }
  0x2a   : > { %p3797_p7 = pnand %p3796_p6, %p3790_p2 }
  0x2c   : > { %3800 = shalt.err (!%p3797_p7)
}
  0x2d   : > { %s3917_s14 = smov 64   ;;  %s3918_s20 = smov 4  }
  0x2e   : > { %3284 = dma.hbm_to_vmem [thread:$0]  (!%p4062_p13), %s5172_s1, 256, %s369_s16, [#allocation4], %s3917_s14, %s3917_s14, %s3918_s20  }
  0x2f   : > { %s3919_s15 = smov [#allocation8]  }
  0x30   : > { %s409_s17 = sshll.u32 %s3919_s15, 4  ;;  %s410_s17 = int_to_ptr.vmem [resolvable:$true] %s409_s17 }
  0x31   : > { %s3812_s24 = scalar_lea.vmem %s410_s17, 384  ;;  %p3820_p2 = scmp.lt.s32.totalorder %s410_s17, %s410_s17 }
  0x32   : > { %p3813_p9 = scmp.ne.s32.totalorder %s410_s17, %s3812_s24  ;;  %p3821_p3 = scmp.lt.s32.totalorder %s3812_s24, %s3812_s24 }
  0x34   : > { %p3815_p12 = pnand %p3813_p9, %p3751_p0  ;;  %p3822_p5 = por %p3821_p3, %p3820_p2 }
  0x36   : > { %p3816_p1 = pneg %p3815_p12 }
  0x38   : > { %p3823_p6 = pnand %p3822_p5, %p3816_p1 }
  0x3a   : > { %3826 = shalt.err (!%p3823_p6)
}
  0x3b   : > { %s5244_s27 = smov 128   ;;  %453 = sbr.rel (%p4050_p10) target bundleno = 1372 (0x55c), region = 72 }
  0x3c   : > { %3290 = dma.hbm_to_vmem [thread:$0]  (!%p4062_p13), %s5180_s9, 384, %s410_s17, [#allocation7], %s5244_s27, %s5244_s27, %s3916_s29  }
  0x40   : > { %3878 = dma.done.wait (%p4054_p11), [#allocation4], 256  }
  0x41   : > { %3880 = vsyncadd (%p4054_p11), [#allocation4], 4294967040 }
  0x42   : > { %3882 = dma.done.wait (%p4054_p11), [#allocation7], 20864  }
  0x43   : > { %3884 = vsyncadd (%p4054_p11), [#allocation7], 4294946432  ;;  %p512_p0 = scmp.lt.s32.totalorder %s3903_s28, 1  ;;  %v3361_v0 = vld [vmem:[#allocation3 + $0x8] sm:$0xff]   ;;  %v3362_v1 = vld [vmem:[#allocation3] sm:$0xff]   ;;  %vm586_vm0 = vcmask 261120  }
  0x44   : > { %3192 = vmatprep.subr.bf16.mxu0 %v3361_v0  ;;  %v3369_v6 = vld [vmem:[%s5174_s3 + $0x5c] ss:$40 sps:$4 sm:$0xff]   ;;  %v3367_v8 = vld [vmem:[%s5174_s3 + $0x58] ss:$40 sps:$4 sm:$0xff]   ;;  %v3374_v10 = vld [vmem:[%s5174_s3 + $0xc] ss:$40 sps:$4 sm:$0xff]  }
  0x45   : > { %s4110_s20 = scalar_select %p512_p0, %s3903_s28, 1  ;;  %3193 = vmatpush3.bf16.msra.mxu0 %v3361_v0  ;;  %v3370_v7 = vld [vmem:[%s5174_s3 + $0x54] ss:$40 sps:$4 sm:$0xff]   ;;  %v3375_v9 = vld [vmem:[%s5174_s3 + $0x50] ss:$40 sps:$4 sm:$0xff]   ;;  %v3920_v14 = vmov 0  }
  0x46   : > { %3194 = vmatprep.subr.bf16.mxu0 %v3362_v1  ;;  %914 = vmatprep.subr.bf16.mxu1 %v3370_v7  ;;  %v3376_v11 = vld [vmem:[%s5174_s3 + $0x4] ss:$40 sps:$4 sm:$0xff]   ;;  %v3372_v12 = vld [vmem:[%s5174_s3 + $0x8] ss:$40 sps:$4 sm:$0xff]   ;;  %v2923_v18 = vld [vmem:[%s5173_s2] ss:$0 sm:$0xff] }
  0x47   : > { %s2980_s29 = sshll.u32 %s4110_s20, 5  ;;  %915 = vmatpush1.bf16.msra.mxu1 %v3375_v9  ;;  %v3378_v13 = vld [vmem:[%s5174_s3] ss:$40 sps:$4 sm:$0xff]   ;;  %934 = vmatprep.mubr.bf16.mxu1 %v3920_v14  ;;  %v3381_v15 = vld [vmem:[%s5174_s3 + $0x64] ss:$40 sps:$4 sm:$0xff]   ;;  %vm2557_vm2 = vcmask 1041408   ;;  %s523_s23 = scalar_lea.vmem %s5178_s7, %s4110_s20 }
  0x48   : > { %s519_s24 = scalar_lea.vmem %s5171_s0, %s2980_s29  ;;  %916 = vmatprep.subr.bf16.mxu1 %v3376_v11  ;;  %v3384_v16 = vld [vmem:[%s5174_s3 + $0x6c] ss:$40 sps:$4 sm:$0xff]   ;;  %vm3923_vm3 = vmmov 0   ;;  %vm2553_vm4 = vcmask 146432   ;;  %vm2713_vm5 = vcmask 523264   ;;  %s509_s14 = sand.u32 1, %s3895_s26  }
  0x49   : > { %v3363_v2 = vld [vmem:[%s519_s24] sm:$0xff]   ;;  %v3364_v3 = vld [vmem:[%s519_s24 + $0x8] sm:$0xff]   ;;  %v3365_v4 = vld [vmem:[%s519_s24 + $0x10] sm:$0xff]   ;;  %3195 = vmatpush3.bf16.msra.mxu0 %v3362_v1  ;;  %s2977_s17 = sshll.u32 %s3903_s28, 4  ;;  %s510_s20 = scalar_lea.vmem [#allocation9], %s509_s14 }
  0x4a   : > { %3196 = vmatprep.mubr.msk.bf16.mxu0 %vm586_vm0, %v3363_v2  ;;  %v3366_v5 = vld [vmem:[%s519_s24 + $0x18] sm:$0xff]   ;;  %987 = vmatprep.subr.bf16.mxu0 %v3369_v6  ;;  %s2801_s27 = sshll.u32 %s510_s20, 4  ;;  %s5131_s29 = scalar_lea.hbm %s5184_s13, %s2977_s17  ;;  %s2802_s27 = int_to_ptr.vmem [resolvable:$true] %s2801_s27 }
  0x4b   : > { %917 = vmatpush1.bf16.msra.mxu1 %v3378_v13  ;;  %v3387_v9 = vld [vmem:[%s5174_s3 + $0x14] ss:$40 sps:$4 sm:$0xff]   ;;  %v3385_v13 = vld [vmem:[%s5174_s3 + $0x10] ss:$40 sps:$4 sm:$0xff]   ;;  %s2789_s22 = scalar_lea.sflag [#allocation5], %s509_s14  ;;  %s3827_s19 = scalar_lea.vmem %s2802_s27, 16 }
  0x4c   : > { %3197 = vmatmul.mubr.msk.bf16.vlgmr.msra.gmra.mxu0 %vm586_vm0, %v3364_v3  ;;  %1060 = vmatprep.subr.bf16.mxu1 %v3381_v15  ;;  %v3388_v15 = vld [vmem:[%s5174_s3 + $0x18] ss:$40 sps:$4 sm:$0xff]   ;;  %p3828_p10 = scmp.ne.s32.totalorder %s2802_s27, %s3827_s19  ;;  %s3924_s24 = smov [#allocation9]  }
  0x4d   : > { %3200 = vmatprep.mubr.msk.bf16.mxu0 %vm586_vm0, %v3365_v4  ;;  %988 = vmatpush1.bf16.msra.mxu0 %v3367_v8  ;;  %v3379_v4 = vld [vmem:[%s5174_s3 + $0x60] ss:$40 sps:$4 sm:$0xff]   ;;  %s3831_s28 = sshll.u32 %s3924_s24, 4  ;;  %s3832_s28 = int_to_ptr.vmem [resolvable:$false] %s3831_s28 }
  0x4e   : > { %989 = vmatprep.subr.bf16.mxu0 %v3374_v10  ;;  %v3390_v10 = vld [vmem:[%s5174_s3 + $0x1c] ss:$40 sps:$4 sm:$0xff]   ;;  %p3829_p11 = pnand %p3828_p10, %p4035_p4  ;;  %p3834_p7 = scmp.lt.s32.totalorder %s2802_s27, %s3832_s28 }
  0x50   : > { %p3830_p13 = pneg %p3829_p11 }
  0x51   : > { %990 = vmatpush1.bf16.msra.mxu0 %v3372_v12 }
  0x52   : > { %1133 = vmatprep.subr.bf16.mxu0 %v3384_v16 }
  0x54   : > { %3201 = vmatmul.mubr.msk.bf16.gmra.mxu0 %vm586_vm0, %v3366_v5  ;;  %v3382_v5 = vld [vmem:[%s5174_s3 + $0x68] ss:$40 sps:$4 sm:$0xff]  }
  0x55   : > { %1007 = vmatprep.mubr.bf16.mxu0 %v3920_v14 }
 0x10c   : > { %v3198_v17 = vpop.f32.mrf.mxu0 }
 0x10d   : > { %v4155_v20 = vadd.f32 %v3198_v17, %v2923_v18  ;;  %v3393_v17 = vld [vmem:[%s5174_s3 + $0x74] ss:$40 sps:$4 sm:$0xff]  }
 0x10e   : > { %v633_v19 = vpop.f32.mrf.mxu0 }
 0x10f   : > { %v634_v21 = vadd.f32 %v2923_v18, %v633_v19  ;;  %v666_v26 = vsub.f32 0.0, %v4155_v20 }
 0x110   : > { %v3199_v22 = vpop.f32.mrf.mxu0 }
 0x111   : > { %v664_v23 = vsub.f32 0.0, %v634_v21  ;;  %v4157_v24 = vadd.f32 %v3199_v22, %v2923_v18  ;;  %v676_v34 = vmul.f32 1.442695, %v666_v26 }
 0x112   : > { %v636_v25 = vpop.f32.mrf.mxu0 }
 0x113   : > { %v672_v27 = vmul.f32 1.442695, %v664_v23  ;;  %v667_v28 = vsub.f32 0.0, %v4157_v24  ;;  %v637_v29 = vadd.f32 %v2923_v18, %v636_v25 }
 0x114   : > { %v3202_v30 = vpop.f32.mrf.mxu0 }
 0x115   : > { %3397 = vpow2.f32 %v672_v27  ;;  %v678_v31 = vmul.f32 1.442695, %v667_v28  ;;  %v665_v32 = vsub.f32 0.0, %v637_v29  ;;  %v4169_v43 = vadd.f32 %v3202_v30, %v2923_v18  ;;  %v3391_v30 = vld [vmem:[%s5174_s3 + $0x70] ss:$40 sps:$4 sm:$0xff]  }
 0x116   : > { %v649_v33 = vpop.f32.mrf.mxu0 }
 0x117   : > { %v674_v35 = vmul.f32 1.442695, %v665_v32  ;;  %v4161_v36 = vadd.f32 %v2923_v18, %v649_v33  ;;  %3399 = vpow2.f32 %v678_v31  ;;  %v670_v49 = vsub.f32 0.0, %v4169_v43  ;;  %v3396_v31 = vld [vmem:[%s5174_s3 + $0x24] ss:$40 sps:$4 sm:$0xff]  }
 0x118   : > { %v3203_v37 = vpop.f32.mrf.mxu0  ;;  %v3394_v32 = vld [vmem:[%s5174_s3 + $0x20] ss:$40 sps:$4 sm:$0xff]   ;;  %v5193_v33 = vlaneseq }
 0x119   : > { %3401 = vpow2.f32 %v674_v35  ;;  %v668_v39 = vsub.f32 0.0, %v4161_v36  ;;  %v4166_v41 = vadd.f32 %v3203_v37, %v2923_v18  ;;  %v684_v54 = vmul.f32 1.442695, %v670_v49  ;;  %v4264_v37 = vld [vmem:[%s5175_s4] sm:$0xff] }
 0x11a   : > { %v652_v38 = vpop.f32.mrf.mxu0  ;;  %3403 = vpow2.f32 %v676_v34  ;;  %v4255_v34 = vshrl.u32 %v5193_v33, 7  ;;  %v2032_v33 = vld [vmem:[#allocation6 + $0x1f0] sm:$0xff] }
 0x11b   : > { %v4164_v40 = vadd.f32 %v2923_v18, %v652_v38  ;;  %v680_v44 = vmul.f32 1.442695, %v668_v39  ;;  %v671_v46 = vsub.f32 0.0, %v4166_v41 }
 0x11c   : > { %5245 = vst [vmem:[#allocation19_spill] sm:$0xff] %v4255_v34  ;;  %v4258_v35 = vsub.s32 0, %v4255_v34  ;;  %v4267_v38 = vsub.s32 1, %v4255_v34 }
 0x11d   : > { %v669_v42 = vsub.f32 0.0, %v4164_v40  ;;  %v686_v50 = vmul.f32 1.442695, %v671_v46 }
 0x11e   : > { %5246 = vst [vmem:[#allocation20_spill] sm:$0xff] %v4258_v35  ;;  %5247 = vst [vmem:[#allocation21_spill] sm:$0xff] %v4267_v38  ;;  %v4272_v39 = vrot.slane %v4264_v37, %v4258_v35 }
 0x11f   : > { %v682_v45 = vmul.f32 1.442695, %v669_v42 }
 0x121   : > { %3405 = vpow2.f32 %v682_v45 }
 0x122   : > { %v3398_v47 = vpop.eup %3397  ;;  %3407 = vpow2.f32 %v680_v44 }
 0x123   : > { %v688_v48 = vadd.f32 1.0, %v3398_v47 }
 0x124   : > { %v3400_v51 = vpop.eup %3399 }
 0x125   : > { %3409 = vrcp.f32 %v688_v48  ;;  %v691_v56 = vadd.f32 1.0, %v3400_v51 }
 0x126   : > { %v3402_v52 = vpop.eup %3401  ;;  %3411 = vpow2.f32 %v686_v50 }
 0x127   : > { %v689_v53 = vadd.f32 1.0, %v3402_v52  ;;  %v3404_v55 = vpop.eup %3403 }
 0x128   : > { %v690_v57 = vadd.f32 1.0, %v3404_v55 }
 0x129   : > { %3413 = vrcp.f32 %v689_v53 }
 0x12a   : > { %3415 = vpow2.f32 %v684_v54 }
 0x12b   : > { %3417 = vrcp.f32 %v691_v56 }
 0x12c   : > { %3419 = vrcp.f32 %v690_v57 }
 0x12e   : > { %v3406_v58 = vpop.eup %3405 }
 0x12f   : > { %v3408_v59 = vpop.eup %3407  ;;  %v693_v60 = vadd.f32 1.0, %v3406_v58 }
 0x130   : > { %v692_v61 = vadd.f32 1.0, %v3408_v59 }
 0x131   : > { %3421 = vrcp.f32 %v693_v60 }
 0x132   : > { %v3410_v62 = vpop.eup %3409  ;;  %3423 = vrcp.f32 %v692_v61 }
 0x133   : > { %v3412_v63 = vpop.eup %3411  ;;  %v704_v1 = vmul.f32 %v3410_v62, %v634_v21 }
 0x134   : > { %v695_v7 = vadd.f32 1.0, %v3412_v63 }
 0x136   : > { %v3414_v0 = vpop.eup %3413  ;;  %3425 = vrcp.f32 %v695_v7 }
 0x137   : > { %v705_v2 = vmul.f32 %v3414_v0, %v637_v29  ;;  %v3416_v3 = vpop.eup %3415 }
 0x138   : > { %v3418_v8 = vpop.eup %3417  ;;  %v694_v11 = vadd.f32 1.0, %v3416_v3 }
 0x139   : > { %v4179_v6 = vpack.c.bf16 %v705_v2, %v704_v1  ;;  %v3420_v12 = vpop.eup %3419  ;;  %v707_v16 = vmul.f32 %v3418_v8, %v4157_v24 }
 0x13a   : > { %v706_v18 = vmul.f32 %v3420_v12, %v4155_v20  ;;  %3427 = vrcp.f32 %v694_v11 }
 0x13b   : > { %2954 = vmatmul.mubr.msk.bf16.vlgmr.msra.gmra.mxu1 %vm586_vm0, %v4179_v6  ;;  %2958 = vmatmul.mubr.msk.bf16.vlgmr.msra.gmra.mxu0 %vm586_vm0, %v4179_v6 }
 0x13c   : > { %1061 = vmatpush1.bf16.msra.mxu1 %v3379_v4  ;;  %1134 = vmatpush1.bf16.msra.mxu0 %v3382_v5  ;;  %v713_v19 = vpack.c.bf16 %v707_v16, %v706_v18 }
 0x13d   : > { %944 = vmatprep.mubr.bf16.mxu1 %v3920_v14  ;;  %1017 = vmatprep.mubr.bf16.mxu0 %v3920_v14 }
 0x13e   : > { %1062 = vmatprep.subr.bf16.mxu1 %v3387_v9  ;;  %1135 = vmatprep.subr.bf16.mxu0 %v3390_v10  ;;  %v3422_v21 = vpop.eup %3421 }
 0x13f   : > { %v3424_v22 = vpop.eup %3423  ;;  %v709_v23 = vmul.f32 %v3422_v21, %v4164_v40 }
 0x140   : > { %1063 = vmatpush1.bf16.msra.mxu1 %v3385_v13  ;;  %1136 = vmatpush1.bf16.msra.mxu0 %v3388_v15  ;;  %v708_v24 = vmul.f32 %v3424_v22, %v4161_v36  ;;  %v5191_v36 = vsub.s32 2, %v4255_v34 }
 0x141   : > { %1206 = vmatprep.subr.bf16.mxu1 %v3393_v17 }
 0x142   : > { %v714_v20 = vpack.c.bf16 %v709_v23, %v708_v24  ;;  %v4277_v40 = vrot.slane %v4264_v37, %v5191_v36 }
 0x143   : > { %2955 = vmatmul.mubr.msk.bf16.gmra.mxu1 %vm586_vm0, %v713_v19  ;;  %2959 = vmatmul.mubr.msk.bf16.gmra.mxu0 %vm586_vm0, %v713_v19  ;;  %v3426_v25 = vpop.eup %3425 }
 0x144   : > { %954 = vmatprep.mubr.bf16.mxu1 %v3920_v14  ;;  %1027 = vmatprep.mubr.bf16.mxu0 %v3920_v14  ;;  %v711_v27 = vmul.f32 %v3426_v25, %v4166_v41  ;;  %v4281_v41 = vrot.slane %v4264_v37, %v4267_v38 }
 0x147   : > { %v3428_v26 = vpop.eup %3427 }
 0x148   : > { %v710_v28 = vmul.f32 %v3428_v26, %v4169_v43 }
 0x14a   : > { %v715_v29 = vpack.c.bf16 %v711_v27, %v710_v28 }
 0x14b   : > { %2956 = vmatmul.mubr.msk.bf16.gmra.mxu1 %vm586_vm0, %v714_v20  ;;  %2960 = vmatmul.mubr.msk.bf16.gmra.mxu0 %vm586_vm0, %v714_v20 }
 0x14c   : > { %964 = vmatprep.mubr.bf16.mxu1 %v3920_v14  ;;  %1037 = vmatprep.mubr.bf16.mxu0 %v3920_v14 }
 0x153   : > { %2957 = vmatmul.mubr.msk.bf16.gmra.mxu1 %vm586_vm0, %v715_v29  ;;  %2961 = vmatmul.mubr.msk.bf16.gmra.mxu0 %vm586_vm0, %v715_v29 }
 0x154   : > { %1080 = vmatprep.mubr.bf16.mxu1 %v3920_v14  ;;  %1153 = vmatprep.mubr.bf16.mxu0 %v3920_v14 }
 0x15b   : > { %2962 = vmatmul.mubr.msk.bf16.vlgmr.msra.gmra.mxu1 %vm586_vm0, %v4179_v6  ;;  %2966 = vmatmul.mubr.msk.bf16.vlgmr.msra.gmra.mxu0 %vm586_vm0, %v4179_v6 }
 0x15c   : > { %1090 = vmatprep.mubr.bf16.mxu1 %v3920_v14  ;;  %1163 = vmatprep.mubr.bf16.mxu0 %v3920_v14 }
 0x15d   : > { %1207 = vmatpush1.bf16.msra.mxu1 %v3391_v30 }
 0x15e   : > { %1208 = vmatprep.subr.bf16.mxu1 %v3396_v31 }
 0x161   : > { %1209 = vmatpush1.bf16.msra.mxu1 %v3394_v32 }
 0x163   : > { %2963 = vmatmul.mubr.msk.bf16.gmra.mxu1 %vm586_vm0, %v713_v19  ;;  %2967 = vmatmul.mubr.msk.bf16.gmra.mxu0 %vm586_vm0, %v713_v19 }
 0x164   : > { %1100 = vmatprep.mubr.bf16.mxu1 %v3920_v14  ;;  %1173 = vmatprep.mubr.bf16.mxu0 %v3920_v14 }
 0x16b   : > { %2964 = vmatmul.mubr.msk.bf16.gmra.mxu1 %vm586_vm0, %v714_v20  ;;  %2968 = vmatmul.mubr.msk.bf16.gmra.mxu0 %vm586_vm0, %v714_v20 }
 0x16c   : > { %1110 = vmatprep.mubr.bf16.mxu1 %v3920_v14  ;;  %1183 = vmatprep.mubr.bf16.mxu0 %v3920_v14 }
 0x173   : > { %2965 = vmatmul.mubr.msk.bf16.gmra.mxu1 %vm586_vm0, %v715_v29  ;;  %2969 = vmatmul.mubr.msk.bf16.gmra.mxu0 %vm586_vm0, %v715_v29 }
 0x174   : > { %1226 = vmatprep.mubr.bf16.mxu1 %v3920_v14 }
 0x17b   : > { %2970 = vmatmul.mubr.msk.bf16.vlgmr.msra.gmra.mxu1 %vm586_vm0, %v4179_v6 }
 0x17c   : > { %1236 = vmatprep.mubr.bf16.mxu1 %v3920_v14 }
 0x183   : > { %2971 = vmatmul.mubr.msk.bf16.gmra.mxu1 %vm586_vm0, %v713_v19 }
 0x184   : > { %1246 = vmatprep.mubr.bf16.mxu1 %v3920_v14 }
 0x18b   : > { %2972 = vmatmul.mubr.msk.bf16.gmra.mxu1 %vm586_vm0, %v714_v20 }
 0x18c   : > { %1256 = vmatprep.mubr.bf16.mxu1 %v3920_v14  ;;  %v5192_v14 = vsub.s32 3, %v4255_v34 }
 0x18e   : > { %v4286_v42 = vrot.slane %v4264_v37, %v5192_v14 }
 0x193   : > { %2973 = vmatmul.mubr.msk.bf16.gmra.mxu1 %vm586_vm0, %v715_v29 }
 0x1fb   : > { %v936_v43 = vpop.f32.mrf.mxu1  ;;  %v1009_v44 = vpop.f32.mrf.mxu0 }
 0x1fc   : > { %v4289_v45 = vadd.f32 %v936_v43, %v4272_v39  ;;  %v4292_v46 = vadd.f32 %v1009_v44, %v4277_v40 }
 0x1fd   : > { %v938_v47 = vpop.f32.mrf.mxu1  ;;  %v1011_v48 = vpop.f32.mrf.mxu0 }
 0x1fe   : > { %v1267_v49 = vsub.f32 0.0, %v4289_v45  ;;  %v1269_v50 = vsub.f32 0.0, %v4292_v46  ;;  %v4297_v51 = vadd.f32 %v938_v47, %v4281_v41  ;;  %v4300_v52 = vadd.f32 %v1011_v48, %v4286_v42 }
 0x1ff   : > { %v940_v53 = vpop.f32.mrf.mxu1  ;;  %v1013_v54 = vpop.f32.mrf.mxu0 }
 0x200   : > { %v1347_v55 = vmul.f32 1.442695, %v1267_v49  ;;  %v1351_v56 = vmul.f32 1.442695, %v1269_v50  ;;  %v1268_v57 = vsub.f32 0.0, %v4297_v51  ;;  %v1270_v58 = vsub.f32 0.0, %v4300_v52 }
 0x201   : > { %v4305_v59 = vadd.f32 %v940_v53, %v4272_v39  ;;  %v4308_v60 = vadd.f32 %v1013_v54, %v4277_v40  ;;  %v942_v61 = vpop.f32.mrf.mxu1  ;;  %v1015_v62 = vpop.f32.mrf.mxu0 }
 0x202   : > { %3429 = vpow2.f32 %v1347_v55  ;;  %v1349_v63 = vmul.f32 1.442695, %v1268_v57  ;;  %v1353_v0 = vmul.f32 1.442695, %v1270_v58  ;;  %v4311_v1 = vadd.f32 %v942_v61, %v4281_v41 }
 0x203   : > { %3431 = vpow2.f32 %v1351_v56  ;;  %v1277_v2 = vsub.f32 0.0, %v4305_v59  ;;  %v1279_v3 = vsub.f32 0.0, %v4308_v60  ;;  %v4316_v4 = vadd.f32 %v1015_v62, %v4286_v42  ;;  %v946_v5 = vpop.f32.mrf.mxu1  ;;  %v1019_v6 = vpop.f32.mrf.mxu0 }
 0x204   : > { %3433 = vpow2.f32 %v1349_v63  ;;  %v1278_v7 = vsub.f32 0.0, %v4311_v1  ;;  %v4320_v8 = vadd.f32 %v946_v5, %v4272_v39  ;;  %v4323_v9 = vadd.f32 %v1019_v6, %v4277_v40 }
 0x205   : > { %3435 = vpow2.f32 %v1353_v0  ;;  %v1367_v10 = vmul.f32 1.442695, %v1277_v2  ;;  %v1371_v11 = vmul.f32 1.442695, %v1279_v3  ;;  %v1280_v12 = vsub.f32 0.0, %v4316_v4  ;;  %v948_v13 = vpop.f32.mrf.mxu1  ;;  %v1021_v15 = vpop.f32.mrf.mxu0 }
 0x206   : > { %v1369_v16 = vmul.f32 1.442695, %v1278_v7  ;;  %v1287_v17 = vsub.f32 0.0, %v4320_v8  ;;  %v1289_v18 = vsub.f32 0.0, %v4323_v9  ;;  %v4329_v19 = vadd.f32 %v948_v13, %v4281_v41 }
 0x207   : > { %3437 = vpow2.f32 %v1367_v10  ;;  %v1373_v21 = vmul.f32 1.442695, %v1280_v12  ;;  %v4332_v22 = vadd.f32 %v1021_v15, %v4286_v42  ;;  %v950_v23 = vpop.f32.mrf.mxu1  ;;  %v1023_v24 = vpop.f32.mrf.mxu0 }
 0x208   : > { %3439 = vpow2.f32 %v1371_v11  ;;  %v1387_v20 = vmul.f32 1.442695, %v1287_v17  ;;  %v1391_v25 = vmul.f32 1.442695, %v1289_v18  ;;  %v1288_v26 = vsub.f32 0.0, %v4329_v19 }
 0x209   : > { %3441 = vpow2.f32 %v1369_v16  ;;  %v1290_v27 = vsub.f32 0.0, %v4332_v22  ;;  %v4337_v28 = vadd.f32 %v950_v23, %v4272_v39  ;;  %v4340_v29 = vadd.f32 %v1023_v24, %v4277_v40  ;;  %v952_v30 = vpop.f32.mrf.mxu1  ;;  %v1025_v31 = vpop.f32.mrf.mxu0 }
 0x20a   : > { %3443 = vpow2.f32 %v1373_v21  ;;  %v1389_v32 = vmul.f32 1.442695, %v1288_v26  ;;  %v4343_v43 = vadd.f32 %v952_v30, %v4281_v41  ;;  %v4346_v44 = vadd.f32 %v1025_v31, %v4286_v42 }
 0x20b   : > { %3445 = vpow2.f32 %v1387_v20  ;;  %v1393_v47 = vmul.f32 1.442695, %v1290_v27  ;;  %v1297_v48 = vsub.f32 0.0, %v4337_v28  ;;  %v1299_v49 = vsub.f32 0.0, %v4340_v29  ;;  %v956_v50 = vpop.f32.mrf.mxu1  ;;  %v1029_v53 = vpop.f32.mrf.mxu0 }
 0x20c   : > { %3447 = vpow2.f32 %v1391_v25  ;;  %v1298_v54 = vsub.f32 0.0, %v4343_v43  ;;  %v1300_v63 = vsub.f32 0.0, %v4346_v44  ;;  %v4355_v26 = vadd.f32 %v956_v50, %v4272_v39 }
 0x20d   : > { %3449 = vpow2.f32 %v1389_v32  ;;  %v1407_v55 = vmul.f32 1.442695, %v1297_v48  ;;  %v1411_v56 = vmul.f32 1.442695, %v1299_v49  ;;  %v958_v57 = vpop.f32.mrf.mxu1  ;;  %v1031_v58 = vpop.f32.mrf.mxu0  ;;  %v4358_v31 = vadd.f32 %v1029_v53, %v4277_v40 }
 0x20e   : > { %3451 = vpow2.f32 %v1393_v47  ;;  %v1409_v61 = vmul.f32 1.442695, %v1298_v54  ;;  %v1413_v15 = vmul.f32 1.442695, %v1300_v63  ;;  %v4363_v49 = vadd.f32 %v958_v57, %v4281_v41 }
 0x20f   : > { %v3430_v62 = vpop.eup %3429  ;;  %3453 = vpow2.f32 %v1407_v55  ;;  %v960_v0 = vpop.f32.mrf.mxu1  ;;  %v4366_v50 = vadd.f32 %v1031_v58, %v4286_v42  ;;  %v1307_v63 = vsub.f32 0.0, %v4355_v26 }
 0x210   : > { %v3432_v2 = vpop.eup %3431  ;;  %v1507_v3 = vadd.f32 1.0, %v3430_v62  ;;  %3455 = vpow2.f32 %v1411_v56  ;;  %v1033_v7 = vpop.f32.mrf.mxu0 }
 0x211   : > { %v3434_v5 = vpop.eup %3433  ;;  %v1509_v6 = vadd.f32 1.0, %v3432_v2  ;;  %v962_v10 = vpop.f32.mrf.mxu1  ;;  %3457 = vpow2.f32 %v1409_v61  ;;  %5248 = vst [vmem:[#allocation22_spill] sm:$0xff] %v4366_v50 }
 0x212   : > { %v3436_v11 = vpop.eup %3435  ;;  %v1508_v12 = vadd.f32 1.0, %v3434_v5  ;;  %3459 = vrcp.f32 %v1507_v3  ;;  %v1035_v23 = vpop.f32.mrf.mxu0  ;;  %v1309_v5 = vsub.f32 0.0, %v4358_v31 }
 0x213   : > { %v1510_v13 = vadd.f32 1.0, %v3436_v11  ;;  %v966_v16 = vpop.f32.mrf.mxu1  ;;  %3461 = vrcp.f32 %v1509_v6  ;;  %v4374_v6 = vadd.f32 %v960_v0, %v4272_v39 }
 0x214   : > { %v3438_v17 = vpop.eup %3437  ;;  %3463 = vrcp.f32 %v1508_v12  ;;  %v1039_v56 = vpop.f32.mrf.mxu0 }
 0x215   : > { %v3440_v18 = vpop.eup %3439  ;;  %v1517_v21 = vadd.f32 1.0, %v3438_v17  ;;  %v4352_v24 = vpop.f32.mrf.mxu1  ;;  %3465 = vrcp.f32 %v1510_v13  ;;  %5249 = vst [vmem:[#allocation23_spill] sm:$0xff] %v4374_v6  ;;  %v1308_v13 = vsub.f32 0.0, %v4363_v49 }
 0x216   : > { %v3442_v20 = vpop.eup %3441  ;;  %v1519_v25 = vadd.f32 1.0, %v3440_v18  ;;  %3467 = vpow2.f32 %v1413_v15  ;;  %v4380_v15 = vadd.f32 %v1033_v7, %v4277_v40  ;;  %v1041_v0 = vpop.f32.mrf.mxu0  ;;  %v1431_v7 = vmul.f32 1.442695, %v1309_v5 }
 0x217   : > { %v3444_v27 = vpop.eup %3443  ;;  %v1518_v30 = vadd.f32 1.0, %v3442_v20  ;;  %v4360_v32 = vpop.f32.mrf.mxu1  ;;  %3469 = vrcp.f32 %v1517_v21  ;;  %v1310_v21 = vsub.f32 0.0, %v4366_v50  ;;  %v4384_v20 = vadd.f32 %v962_v10, %v4281_v41  ;;  %v2025_v50 = vld [vmem:[#allocation6 + $0x1b8] sm:$0xff] }
 0x218   : > { %v3446_v47 = vpop.eup %3445  ;;  %v1520_v48 = vadd.f32 1.0, %v3444_v27  ;;  %3471 = vrcp.f32 %v1519_v25  ;;  %5250 = vst [vmem:[#allocation24_spill] sm:$0xff] %v4380_v15 }
 0x219   : > { %v3448_v54 = vpop.eup %3447  ;;  %v1527_v55 = vadd.f32 1.0, %v3446_v47  ;;  %v4368_v61 = vpop.f32.mrf.mxu1  ;;  %3473 = vrcp.f32 %v1518_v30  ;;  %5251 = vst [vmem:[#allocation25_spill] sm:$0xff] %v4384_v20  ;;  %v1427_v30 = vmul.f32 1.442695, %v1307_v63  ;;  %v4389_v47 = vadd.f32 %v1035_v23, %v4286_v42  ;;  %v2001_v23 = vld [vmem:[#allocation6 + $0xf8] sm:$0xff] }
 0x21a   : > { %v3450_v62 = vpop.eup %3449  ;;  %v1529_v53 = vadd.f32 1.0, %v3448_v54  ;;  %3475 = vrcp.f32 %v1520_v48  ;;  %v1317_v54 = vsub.f32 0.0, %v4374_v6  ;;  %v4401_v63 = vadd.f32 %v1039_v56, %v4277_v40  ;;  %2987 = vmatprep.subr.mxu0 %v2001_v23 }
 0x21b   : > { %v3452_v3 = vpop.eup %3451  ;;  %v1528_v57 = vadd.f32 1.0, %v3450_v62  ;;  %v4376_v58 = vpop.f32.mrf.mxu1  ;;  %3477 = vrcp.f32 %v1527_v55  ;;  %5252 = vst [vmem:[#allocation26_spill] sm:$0xff] %v4389_v47  ;;  %v4393_v55 = vadd.f32 %v966_v16, %v4272_v39  ;;  %v1433_v5 = vmul.f32 1.442695, %v1310_v21 }
 0x21c   : > { %v3454_v11 = vpop.eup %3453  ;;  %v1530_v12 = vadd.f32 1.0, %v3452_v3  ;;  %3479 = vrcp.f32 %v1529_v53  ;;  %v1429_v53 = vmul.f32 1.442695, %v1308_v13  ;;  %v1319_v3 = vsub.f32 0.0, %v4380_v15  ;;  %5254 = vst [vmem:[#allocation28_spill] sm:$0xff] %v4401_v63  ;;  %v1985_v13 = vld [vmem:[#allocation6 + $0x78] sm:$0xff] }
 0x21d   : > { %v3456_v17 = vpop.eup %3455  ;;  %v1537_v18 = vadd.f32 1.0, %v3454_v11  ;;  %v4386_v25 = vpop.f32.mrf.mxu1  ;;  %3481 = vrcp.f32 %v1528_v57  ;;  %5253 = vst [vmem:[#allocation27_spill] sm:$0xff] %v4393_v55  ;;  %v2033_v57 = vld [vmem:[#allocation6 + $0x1f8] sm:$0xff]  ;;  %v1318_v16 = vsub.f32 0.0, %v4384_v20  ;;  %v1320_v14 = vsub.f32 0.0, %v4389_v47  ;;  %2988 = vmatpush3.msra.mxu0 %v1985_v13 }
 0x21e   : > { %v1539_v27 = vadd.f32 1.0, %v3456_v17  ;;  %v3458_v48 = vpop.eup %3457  ;;  %3483 = vrcp.f32 %v1530_v12  ;;  %v4408_v12 = vadd.f32 %v4352_v24, %v4281_v41  ;;  %v1043_v17 = vpop.f32.mrf.mxu0  ;;  %3022 = vmatprep.subr.mxu1 %v2033_v57  ;;  %v2000_v24 = vld [vmem:[#allocation6 + $0xf0] sm:$0xff]  ;;  %v1447_v23 = vmul.f32 1.442695, %v1317_v54  ;;  %v2031_v54 = vld [vmem:[#allocation6 + $0x1e8] sm:$0xff] }
 0x21f   : > { %v4395_v62 = vpop.f32.mrf.mxu1  ;;  %v4397_v10 = vpop.eup %3459  ;;  %3485 = vrcp.f32 %v1537_v18  ;;  %v2017_v18 = vld [vmem:[#allocation6 + $0x178] sm:$0xff]  ;;  %v1538_v56 = vadd.f32 1.0, %v3458_v48  ;;  %v1327_v57 = vsub.f32 0.0, %v4393_v55  ;;  %2989 = vmatprep.subr.mxu0 %v2000_v24  ;;  %v2016_v48 = vld [vmem:[#allocation6 + $0x170] sm:$0xff]  ;;  %v1451_v13 = vmul.f32 1.442695, %v1319_v3 }
 0x220   : > { %v4403_v11 = vpop.eup %3461  ;;  %3487 = vrcp.f32 %v1539_v27  ;;  %5255 = vst [vmem:[#allocation29_spill] sm:$0xff] %v4408_v12  ;;  %v4414_v27 = vadd.f32 %v1041_v0, %v4286_v42  ;;  %3023 = vmatpush3.msra.mxu1 %v2017_v18  ;;  %v1984_v0 = vld [vmem:[#allocation6 + $0x70] sm:$0xff]  ;;  %v1329_v18 = vsub.f32 0.0, %v4401_v63  ;;  %v4429_v35 = vadd.f32 %v1043_v17, %v4277_v40  ;;  %v1983_v3 = vld [vmem:[#allocation6 + $0x68] sm:$0xff] }
 0x221   : > { %v4410_v36 = vpop.eup %3463  ;;  %3489 = vpow2.f32 %v1427_v30  ;;  %v4416_v21 = vpop.f32.mrf.mxu1  ;;  %v4423_v30 = vadd.f32 %v4360_v32, %v4272_v39  ;;  %3024 = vmatprep.subr.mxu1 %v2032_v33  ;;  %2990 = vmatpush3.msra.mxu0 %v1984_v0  ;;  %v1449_v39 = vmul.f32 1.442695, %v1318_v16  ;;  %v1328_v33 = vsub.f32 0.0, %v4408_v12  ;;  %v2015_v40 = vld [vmem:[#allocation6 + $0x168] sm:$0xff]  ;;  %v2030_v16 = vld [vmem:[#allocation6 + $0x1e0] sm:$0xff] }
 0x222   : > { %5256 = vst [vmem:[#allocation30_spill] sm:$0xff] %v4414_v27  ;;  %v4418_v2 = vpop.eup %3465  ;;  %3491 = vpow2.f32 %v1431_v7  ;;  %5258 = vst [vmem:[#allocation32_spill] sm:$0xff] %v4429_v35  ;;  %3025 = vmatpush3.msra.mxu1 %v2016_v48  ;;  %v1999_v7 = vld [vmem:[#allocation6 + $0xe8] sm:$0xff]  ;;  %v4436_v32 = vadd.f32 %v4368_v61, %v4281_v41  ;;  %v1453_v24 = vmul.f32 1.442695, %v1320_v14  ;;  %v1330_v0 = vsub.f32 0.0, %v4414_v27 }
 0x223   : > { %5257 = vst [vmem:[#allocation31_spill] sm:$0xff] %v4423_v30  ;;  %v4425_v38 = vpop.eup %3467  ;;  %3493 = vpow2.f32 %v1429_v53  ;;  %v1045_v53 = vpop.f32.mrf.mxu0  ;;  %2991 = vmatprep.subr.mxu0 %v1999_v7  ;;  %3026 = vmatprep.subr.mxu1 %v2031_v54  ;;  %v1467_v41 = vmul.f32 1.442695, %v1327_v57  ;;  %v1337_v61 = vsub.f32 0.0, %v4423_v30  ;;  %v5260_v7 = vsub.s32 4, %v4255_v34  ;;  %v1982_v14 = vld [vmem:[#allocation6 + $0x60] sm:$0xff] }
 0x224   : > { %v4431_v55 = vpop.eup %3469  ;;  %3495 = vpow2.f32 %v1433_v5  ;;  %5259 = vst [vmem:[#allocation33_spill] sm:$0xff] %v4436_v32  ;;  %v4441_v48 = vpop.f32.mrf.mxu1  ;;  %2992 = vmatpush3.msra.mxu0 %v1983_v3  ;;  %3027 = vmatpush3.msra.mxu1 %v2015_v40  ;;  %v1998_v5 = vld [vmem:[#allocation6 + $0xe0] sm:$0xff]  ;;  %v1471_v3 = vmul.f32 1.442695, %v1329_v18  ;;  %v1339_v40 = vsub.f32 0.0, %v4429_v35  ;;  %v1997_v57 = vld [vmem:[#allocation6 + $0xd8] sm:$0xff] }
 0x225   : > { %v4438_v17 = vpop.eup %3471  ;;  %3497 = vrcp.f32 %v1538_v56  ;;  %v4449_v54 = vrot.slane %v4264_v37, %v5260_v7  ;;  %2993 = vmatprep.subr.mxu0 %v1998_v5  ;;  %3028 = vmatprep.subr.mxu1 %v2030_v16  ;;  %v2014_v56 = vld [vmem:[#allocation6 + $0x160] sm:$0xff]  ;;  %v2029_v30 = vld [vmem:[#allocation6 + $0x1d8] sm:$0xff]  ;;  %v1469_v7 = vmul.f32 1.442695, %v1328_v33  ;;  %v1338_v5 = vsub.f32 0.0, %v4436_v32  ;;  %v1155_v16 = vpop.f32.mrf.mxu0  ;;  %v1996_v33 = vld [vmem:[#allocation6 + $0xd0] sm:$0xff] }
 0x226   : > { %v4443_v63 = vpop.eup %3473  ;;  %3499 = vpow2.f32 %v1447_v23  ;;  %2994 = vmatpush3.msra.mxu0 %v1982_v14  ;;  %3029 = vmatpush3.msra.mxu1 %v2014_v56  ;;  %v2013_v18 = vld [vmem:[#allocation6 + $0x158] sm:$0xff]  ;;  %v1473_v14 = vmul.f32 1.442695, %v1330_v0  ;;  %v4462_v56 = vadd.f32 %v1045_v53, %v4286_v42  ;;  %v2028_v32 = vld [vmem:[#allocation6 + $0x1d0] sm:$0xff]  ;;  %v1491_v42 = vmul.f32 1.442695, %v1339_v40 }
 0x227   : > { %v4451_v27 = vpop.eup %3475  ;;  %3501 = vpow2.f32 %v1451_v13  ;;  %2995 = vmatprep.subr.mxu0 %v1997_v57  ;;  %3030 = vmatprep.subr.mxu1 %v2029_v30  ;;  %v1981_v13 = vld [vmem:[#allocation6 + $0x58] sm:$0xff]  ;;  %v1487_v30 = vmul.f32 1.442695, %v1337_v61  ;;  %v1980_v57 = vld [vmem:[#allocation6 + $0x50] sm:$0xff]  ;;  %v4473_v53 = vadd.f32 %v4376_v58, %v4449_v54  ;;  %v2027_v61 = vld [vmem:[#allocation6 + $0x1c8] sm:$0xff]  ;;  %v4482_v23 = vpop.f32.mrf.mxu0  ;;  %v5264_v20 = vsub.s32 7, %v4255_v34 }
 0x228   : > { %v4455_v12 = vpop.eup %3477  ;;  %3503 = vpow2.f32 %v1449_v39  ;;  %5261 = vst [vmem:[#allocation34_spill] sm:$0xff] %v4462_v56  ;;  %v4465_v39 = vpop.f32.mrf.mxu1  ;;  %2996 = vmatpush3.msra.mxu0 %v1981_v13  ;;  %3031 = vmatpush3.msra.mxu1 %v2013_v18  ;;  %v5262_v13 = vsub.s32 6, %v4255_v34  ;;  %v2011_v58 = vld [vmem:[#allocation6 + $0x148] sm:$0xff] }
 0x229   : > { %v4459_v35 = vpop.eup %3479  ;;  %3505 = vpow2.f32 %v1453_v24  ;;  %2997 = vmatprep.subr.mxu0 %v1996_v33  ;;  %3032 = vmatprep.subr.mxu1 %v2028_v32  ;;  %v2012_v24 = vld [vmem:[#allocation6 + $0x150] sm:$0xff]  ;;  %v1489_v33 = vmul.f32 1.442695, %v1338_v5 }
 0x22a   : > { %v4467_v47 = vpop.eup %3481  ;;  %3507 = vpow2.f32 %v1467_v41  ;;  %v4478_v18 = vrot.slane %v4264_v37, %v5262_v13  ;;  %2998 = vmatpush3.msra.mxu0 %v1980_v57  ;;  %3033 = vmatpush3.msra.mxu1 %v2012_v24  ;;  %v1995_v41 = vld [vmem:[#allocation6 + $0xc8] sm:$0xff]  ;;  %v1340_v13 = vsub.f32 0.0, %v4462_v56  ;;  %v5263_v57 = vsub.s32 5, %v4255_v34  ;;  %v4497_v5 = vpop.f32.mrf.mxu1  ;;  %v2010_v34 = vld [vmem:[#allocation6 + $0x140] sm:$0xff] }
 0x22b   : > { %v4469_v0 = vpop.eup %3483  ;;  %3509 = vpow2.f32 %v1471_v3  ;;  %2999 = vmatprep.subr.mxu0 %v1995_v41  ;;  %3034 = vmatprep.subr.mxu1 %v2027_v61  ;;  %v1979_v3 = vld [vmem:[#allocation6 + $0x48] sm:$0xff]  ;;  %v1994_v41 = vld [vmem:[#allocation6 + $0xc0] sm:$0xff]  ;;  %v1540_v56 = vadd.f32 1.0, %v4425_v38  ;;  %v1669_v38 = vmul.f32 %v4403_v11, %v4292_v46 }
 0x22c   : > { %v4480_v32 = vpop.eup %3485  ;;  %3511 = vpow2.f32 %v1469_v7  ;;  %v4490_v24 = vrot.slane %v4264_v37, %v5263_v57  ;;  %v4495_v7 = vrot.slane %v4264_v37, %v5264_v20  ;;  %3000 = vmatpush3.msra.mxu0 %v1979_v3  ;;  %3035 = vmatpush3.msra.mxu1 %v2011_v58  ;;  %v2026_v61 = vld [vmem:[#allocation6 + $0x1c0] sm:$0xff]  ;;  %v1271_v20 = vsub.f32 0.0, %v4473_v53  ;;  %v1993_v58 = vld [vmem:[#allocation6 + $0xb8] sm:$0xff] }
 0x22d   : > { %v4484_v40 = vpop.eup %3487  ;;  %3513 = vpow2.f32 %v1473_v14  ;;  %v1667_v14 = vmul.f32 %v4397_v10, %v4289_v45  ;;  %3001 = vmatprep.subr.mxu0 %v1994_v41  ;;  %3036 = vmatprep.subr.mxu1 %v2026_v61  ;;  %v1978_v57 = vld [vmem:[#allocation6 + $0x40] sm:$0xff]  ;;  %v4504_v3 = vadd.f32 %v1155_v16, %v4478_v18  ;;  %v1677_v10 = vmul.f32 %v4431_v55, %v4305_v59  ;;  %v2009_v16 = vld [vmem:[#allocation6 + $0x138] sm:$0xff]  ;;  %v2024_v55 = vld [vmem:[#allocation6 + $0x1b0] sm:$0xff] }
 0x22e   : > { %v3490_v15 = vpop.eup %3489  ;;  %3515 = vpow2.f32 %v1487_v30  ;;  %3002 = vmatpush3.msra.mxu0 %v1978_v57  ;;  %3037 = vmatpush3.msra.mxu1 %v2010_v34  ;;  %v1668_v34 = vmul.f32 %v4410_v36, %v4297_v51  ;;  %v4516_v61 = vmul.f32 %v4418_v2, %v4300_v52  ;;  %v1493_v46 = vmul.f32 1.442695, %v1340_v13  ;;  %v1976_v2 = vld [vmem:[#allocation6 + $0x30] sm:$0xff] }
 0x22f   : > { %v3492_v6 = vpop.eup %3491  ;;  %v1547_v37 = vadd.f32 1.0, %v3490_v15  ;;  %3517 = vpow2.f32 %v1491_v42  ;;  %v4510_v15 = vpop.f32.mrf.mxu0  ;;  %3003 = vmatprep.subr.mxu0 %v1993_v58  ;;  %3038 = vmatprep.subr.mxu1 %v2025_v50  ;;  %v1977_v42 = vld [vmem:[#allocation6 + $0x38] sm:$0xff]  ;;  %v4520_v59 = vadd.f32 %v4386_v25, %v4490_v24  ;;  %v1992_v50 = vld [vmem:[#allocation6 + $0xb0] sm:$0xff]  ;;  %v1679_v36 = vmul.f32 %v4438_v17, %v4308_v60  ;;  %v2023_v60 = vld [vmem:[#allocation6 + $0x1a8] sm:$0xff] }
 0x230   : > { %v3494_v45 = vpop.eup %3493  ;;  %v1549_v30 = vadd.f32 1.0, %v3492_v6  ;;  %3519 = vpow2.f32 %v1489_v33  ;;  %v4522_v6 = vpop.f32.mrf.mxu1  ;;  %3004 = vmatpush3.msra.mxu0 %v1977_v42  ;;  %3039 = vmatpush3.msra.mxu1 %v2009_v16  ;;  %v1678_v51 = vmul.f32 %v4443_v63, %v4311_v1  ;;  %v2008_v25 = vld [vmem:[#allocation6 + $0x130] sm:$0xff]  ;;  %v4530_v57 = vmul.f32 1.442695, %v1271_v20  ;;  %v1991_v42 = vld [vmem:[#allocation6 + $0xa8] sm:$0xff] }
 0x231   : > { %v3496_v41 = vpop.eup %3495  ;;  %3521 = vrcp.f32 %v1540_v56  ;;  %v1548_v52 = vadd.f32 1.0, %v3494_v45  ;;  %3005 = vmatprep.subr.mxu0 %v1992_v50  ;;  %3040 = vmatprep.subr.mxu1 %v2024_v55  ;;  %v1273_v58 = vsub.f32 0.0, %v4504_v3  ;;  %v1749_v16 = vadd.f32 %v1677_v10, %v1667_v14  ;;  %v4535_v56 = vpop.f32.mrf.mxu0  ;;  %v2007_v20 = vld [vmem:[#allocation6 + $0x128] sm:$0xff] }
 0x232   : > { %v4524_v11 = vpop.eup %3497  ;;  %3523 = vrcp.f32 %v1547_v37  ;;  %v1550_v13 = vadd.f32 1.0, %v3496_v41  ;;  %3006 = vmatpush3.msra.mxu0 %v1976_v2  ;;  %3041 = vmatpush3.msra.mxu1 %v2008_v25  ;;  %v1680_v1 = vmul.f32 %v4451_v27, %v4316_v4  ;;  %v1975_v37 = vld [vmem:[#allocation6 + $0x28] sm:$0xff]  ;;  %v1687_v41 = vmul.f32 %v4455_v12, %v4320_v8  ;;  %v4540_v14 = vpop.f32.mrf.mxu1  ;;  %v1990_v4 = vld [vmem:[#allocation6 + $0xa0] sm:$0xff] }
 0x233   : > { %v3500_v33 = vpop.eup %3499  ;;  %3525 = vrcp.f32 %v1549_v30  ;;  %3007 = vmatprep.subr.mxu0 %v1991_v42  ;;  %3042 = vmatprep.subr.mxu1 %v2023_v60  ;;  %v1272_v55 = vsub.f32 0.0, %v4520_v59  ;;  %v2022_v27 = vld [vmem:[#allocation6 + $0x1a0] sm:$0xff]  ;;  %v1775_v30 = vadd.f32 %v1679_v36, %v1669_v38  ;;  %v4542_v2 = vadd.f32 %v1678_v51, %v1668_v34 }
 0x234   : > { %v3502_v17 = vpop.eup %3501  ;;  %v1557_v63 = vadd.f32 1.0, %v3500_v33  ;;  %3527 = vpow2.f32 %v1493_v46  ;;  %3008 = vmatpush3.msra.mxu0 %v1975_v37  ;;  %3043 = vmatpush3.msra.mxu1 %v2007_v20  ;;  %v1974_v33 = vld [vmem:[#allocation6 + $0x20] sm:$0xff]  ;;  %v1689_v12 = vmul.f32 %v4459_v35, %v4323_v9  ;;  %v4546_v42 = vmul.f32 1.442695, %v1273_v58  ;;  %v2021_v37 = vld [vmem:[#allocation6 + $0x198] sm:$0xff] }
 0x235   : > { %v3504_v45 = vpop.eup %3503  ;;  %v1559_v50 = vadd.f32 1.0, %v3502_v17  ;;  %3529 = vrcp.f32 %v1548_v52  ;;  %3009 = vmatprep.subr.mxu0 %v1990_v4  ;;  %3044 = vmatprep.subr.mxu1 %v2022_v27  ;;  %v2006_v60 = vld [vmem:[#allocation6 + $0x120] sm:$0xff]  ;;  %v1989_v17 = vld [vmem:[#allocation6 + $0x98] sm:$0xff]  ;;  %v4549_v34 = vadd.f32 %v1680_v1, %v4516_v61  ;;  %v4553_v51 = vadd.f32 %v4482_v23, %v4495_v7  ;;  %v4555_v52 = vpop.f32.mrf.mxu0  ;;  %v1988_v1 = vld [vmem:[#allocation6 + $0x90] sm:$0xff] }
 0x236   : > { %v3506_v10 = vpop.eup %3505  ;;  %v1558_v25 = vadd.f32 1.0, %v3504_v45  ;;  %3531 = vrcp.f32 %v1550_v13  ;;  %3010 = vmatpush3.msra.mxu0 %v1974_v33  ;;  %3045 = vmatpush3.msra.mxu1 %v2006_v60  ;;  %v1973_v35 = vld [vmem:[#allocation6 + $0x18] sm:$0xff]  ;;  %v4557_v58 = vadd.f32 %v1749_v16, %v1687_v41  ;;  %v4559_v45 = vmul.f32 1.442695, %v1272_v55  ;;  %v4561_v61 = vpop.f32.mrf.mxu1  ;;  %v2020_v23 = vld [vmem:[#allocation6 + $0x190] sm:$0xff] }
 0x237   : > { %v3508_v8 = vpop.eup %3507  ;;  %v1560_v46 = vadd.f32 1.0, %v3506_v10  ;;  %3533 = vrcp.f32 %v1557_v63  ;;  %3011 = vmatprep.subr.mxu0 %v1989_v17  ;;  %v2005_v9 = vld [vmem:[#allocation6 + $0x118] sm:$0xff]  ;;  %3046 = vmatprep.subr.mxu1 %v2021_v37  ;;  %v1688_v4 = vmul.f32 %v4467_v47, %v4329_v19  ;;  %v4567_v16 = vadd.f32 %v4395_v62, %v4449_v54  ;;  %v1972_v41 = vld [vmem:[#allocation6 + $0x10] sm:$0xff]  ;;  %v1987_v19 = vld [vmem:[#allocation6 + $0x88] sm:$0xff]  ;;  %v4574_v17 = vpop.f32.mrf.mxu0 }
 0x238   : > { %v3510_v38 = vpop.eup %3509  ;;  %v1567_v36 = vadd.f32 1.0, %v3508_v8  ;;  %3535 = vrcp.f32 %v1559_v50  ;;  %3012 = vmatpush3.msra.mxu0 %v1973_v35  ;;  %3047 = vmatpush3.msra.mxu1 %v2005_v9  ;;  %v2004_v50 = vld [vmem:[#allocation6 + $0x110] sm:$0xff]  ;;  %v1776_v10 = vadd.f32 %v1775_v30, %v1689_v12  ;;  %v1690_v33 = vmul.f32 %v4469_v0, %v4332_v22  ;;  %v2019_v30 = vld [vmem:[#allocation6 + $0x188] sm:$0xff] }
 0x239   : > { %v3512_v13 = vpop.eup %3511  ;;  %v1569_v20 = vadd.f32 1.0, %v3510_v38  ;;  %3537 = vrcp.f32 %v1558_v25  ;;  %3013 = vmatprep.subr.mxu0 %v1988_v1  ;;  %3048 = vmatprep.subr.mxu1 %v2020_v23  ;;  %v1697_v25 = vmul.f32 %v4480_v32, %v4337_v28  ;;  %v1274_v60 = vsub.f32 0.0, %v4553_v51  ;;  %v4582_v28 = vpop.f32.mrf.mxu1  ;;  %v1971_v32 = vld [vmem:[#allocation6 + $0x8] sm:$0xff]  ;;  %v1986_v38 = vld [vmem:[#allocation6 + $0x80] sm:$0xff] }
 0x23a   : > { %v3514_v63 = vpop.eup %3513  ;;  %v1568_v27 = vadd.f32 1.0, %v3512_v13  ;;  %3539 = vrcp.f32 %v1560_v46  ;;  %3014 = vmatpush3.msra.mxu0 %v1972_v41  ;;  %3049 = vmatpush3.msra.mxu1 %v2004_v50  ;;  %v1699_v22 = vmul.f32 %v4484_v40, %v4340_v29  ;;  %v4580_v46 = vadd.f32 %v4510_v15, %v4478_v18  ;;  %v2003_v37 = vld [vmem:[#allocation6 + $0x108] sm:$0xff]  ;;  %v2018_v29 = vld [vmem:[#allocation6 + $0x180] sm:$0xff] }
 0x23b   : > { %v3516_v55 = vpop.eup %3515  ;;  %v1570_v8 = vadd.f32 1.0, %v3514_v63  ;;  %3541 = vrcp.f32 %v1567_v36  ;;  %3015 = vmatprep.subr.mxu0 %v1987_v19  ;;  %3050 = vmatprep.subr.mxu1 %v2019_v30  ;;  %v1763_v36 = vadd.f32 %v4542_v2, %v1688_v4  ;;  %v1281_v9 = vsub.f32 0.0, %v4567_v16  ;;  %v1970_v40 = vld [vmem:[#allocation6] sm:$0xff]  ;;  %v2065_v2 = vld [vmem:[#allocation6 + $0x2f8] sm:$0xff] }
 0x23c   : > { %v3518_v47 = vpop.eup %3517  ;;  %v1577_v62 = vadd.f32 1.0, %v3516_v55  ;;  %3543 = vrcp.f32 %v1569_v20  ;;  %3016 = vmatpush3.msra.mxu0 %v1971_v32  ;;  %3051 = vmatpush3.msra.mxu1 %v2003_v37  ;;  %v2002_v13 = vld [vmem:[#allocation6 + $0x100] sm:$0xff]  ;;  %v1789_v15 = vadd.f32 %v4549_v34, %v1690_v33  ;;  %v1698_v1 = vmul.f32 %v4524_v11, %v4343_v43  ;;  %v2097_v63 = vld [vmem:[#allocation6 + $0x3f8] sm:$0xff]  ;;  %v1169_v11 = vpop.f32.mrf.mxu0 }
 0x23d   : > { %v3520_v12 = vpop.eup %3519  ;;  %v1579_v0 = vadd.f32 1.0, %v3518_v47  ;;  %3545 = vrcp.f32 %v1568_v27  ;;  %v4591_v23 = vadd.f32 %v4416_v21, %v4490_v24  ;;  %3017 = vmatprep.subr.mxu0 %v1986_v38  ;;  %3052 = vmatprep.subr.mxu1 %v2018_v29  ;;  %v4594_v27 = vadd.f32 %v4557_v58, %v1697_v25  ;;  %v4607_v55 = vpop.f32.mrf.mxu1 }
 0x23e   : > { %v1578_v35 = vadd.f32 1.0, %v3520_v12  ;;  %v3522_v20 = vpop.eup %3521  ;;  %3547 = vrcp.f32 %v1570_v8  ;;  %v4598_v34 = vadd.f32 %v4535_v56, %v4495_v7  ;;  %v4602_v43 = vadd.f32 %v4441_v48, %v4449_v54  ;;  %3018 = vmatpush3.msra.mxu0 %v1970_v40  ;;  %3053 = vmatpush3.msra.mxu1 %v2002_v13 }
 0x23f   : > { %v3524_v4 = vpop.eup %3523  ;;  %3549 = vrcp.f32 %v1577_v62  ;;  %v4604_v41 = vadd.f32 %v1776_v10, %v1699_v22  ;;  %v1361_v50 = vmul.f32 1.442695, %v1274_v60  ;;  %v1283_v58 = vsub.f32 0.0, %v4580_v46  ;;  %3057 = vmatprep.subr.mxu0 %v2065_v2  ;;  %3092 = vmatprep.subr.mxu1 %v2097_v63 }
 0x240   : > { %v3526_v21 = vpop.eup %3525  ;;  %3551 = vrcp.f32 %v1579_v0  ;;  %v1700_v33 = vmul.f32 %v3522_v20, %v4346_v44  ;;  %v1375_v48 = vmul.f32 1.442695, %v1281_v9  ;;  %v4612_v8 = vadd.f32 %v4555_v52, %v4478_v18  ;;  %v1171_v52 = vpop.f32.mrf.mxu0 }
 0x241   : > { %v3528_v56 = vpop.eup %3527  ;;  %3553 = vrcp.f32 %v1578_v35  ;;  %v4614_v10 = vadd.f32 %v1763_v36, %v1698_v1  ;;  %v1282_v25 = vsub.f32 0.0, %v4591_v23  ;;  %v1284_v60 = vsub.f32 0.0, %v4598_v34 }
 0x242   : > { %5265 = vst [vmem:[#allocation35_spill] sm:$0xff] %v4612_v8  ;;  %v3530_v19 = vpop.eup %3529  ;;  %v1580_v47 = vadd.f32 1.0, %v3528_v56  ;;  %3555 = vpow2.f32 %v4530_v57  ;;  %v1291_v44 = vsub.f32 0.0, %v4602_v43  ;;  %v4623_v30 = vadd.f32 %v4465_v39, %v4490_v24  ;;  %v1175_v56 = vpop.f32.mrf.mxu0 }
 0x243   : > { %v3532_v62 = vpop.eup %3531  ;;  %3557 = vpow2.f32 %v4546_v42  ;;  %v1379_v22 = vmul.f32 1.442695, %v1283_v58  ;;  %v4627_v57 = vadd.f32 %v4574_v17, %v4495_v7  ;;  %v4631_v0 = vadd.f32 %v4497_v5, %v4449_v54  ;;  %v4633_v42 = vpop.f32.mrf.mxu1 }
 0x244   : > { %5266 = vst [vmem:[#allocation36_spill] sm:$0xff] %v4623_v30  ;;  %v3534_v12 = vpop.eup %3533  ;;  %3559 = vrcp.f32 %v1580_v47  ;;  %v1790_v37 = vadd.f32 %v1789_v15, %v1700_v33  ;;  %v1293_v39 = vsub.f32 0.0, %v4612_v8  ;;  %v4638_v38 = vadd.f32 %v1169_v11, %v4478_v18  ;;  %v5273_v47 = vld [vmem:[#allocation22_spill] sm:$0xff] }
 0x245   : > { %5267 = vst [vmem:[#allocation37_spill] sm:$0xff] %v4627_v57  ;;  %5268 = vst [vmem:[#allocation38_spill] sm:$0xff] %v4631_v0  ;;  %v3536_v32 = vpop.eup %3535  ;;  %3561 = vpow2.f32 %v4559_v45  ;;  %v1377_v35 = vmul.f32 1.442695, %v1282_v25  ;;  %v4642_v17 = vadd.f32 %v4522_v6, %v4490_v24  ;;  %v4645_v5 = vadd.f32 %v1171_v52, %v4495_v7  ;;  %v4655_v2 = vpop.f32.mrf.mxu1  ;;  %v5274_v52 = vld [vmem:[#allocation23_spill] sm:$0xff] }
 0x246   : > { %5269 = vst [vmem:[#allocation39_spill] sm:$0xff] %v4638_v38  ;;  %v3538_v36 = vpop.eup %3537  ;;  %3563 = vpow2.f32 %v1361_v50  ;;  %v1381_v29 = vmul.f32 1.442695, %v1284_v60  ;;  %v1395_v40 = vmul.f32 1.442695, %v1291_v44  ;;  %v1292_v45 = vsub.f32 0.0, %v4623_v30 }
 0x247   : > { %5270 = vst [vmem:[#allocation40_spill] sm:$0xff] %v4642_v17  ;;  %5271 = vst [vmem:[#allocation41_spill] sm:$0xff] %v4645_v5  ;;  %v3540_v9 = vpop.eup %3539  ;;  %v4650_v13 = vadd.f32 %v4540_v14, %v4449_v54  ;;  %v1707_v15 = vmul.f32 %v3524_v4, %v4355_v26  ;;  %3565 = vpow2.f32 %v1375_v48  ;;  %v1294_v1 = vsub.f32 0.0, %v4627_v57  ;;  %v5277_v57 = vld [vmem:[#allocation26_spill] sm:$0xff] }
 0x248   : > { %v3542_v20 = vpop.eup %3541  ;;  %v1301_v6 = vsub.f32 0.0, %v4631_v0  ;;  %v1709_v11 = vmul.f32 %v3526_v21, %v4358_v31  ;;  %3567 = vpow2.f32 %v1379_v22  ;;  %v1399_v50 = vmul.f32 1.442695, %v1293_v39  ;;  %v5276_v0 = vld [vmem:[#allocation25_spill] sm:$0xff] }
 0x249   : > { %5272 = vst [vmem:[#allocation42_spill] sm:$0xff] %v4650_v13  ;;  %v3544_v63 = vpop.eup %3543  ;;  %v1303_v58 = vsub.f32 0.0, %v4638_v38  ;;  %v1708_v33 = vmul.f32 %v3530_v19, %v4363_v49  ;;  %3569 = vpow2.f32 %v1377_v35  ;;  %v1302_v26 = vsub.f32 0.0, %v4642_v17  ;;  %v4666_v49 = vpop.f32.mrf.mxu1 }
 0x24a   : > { %v3546_v14 = vpop.eup %3545  ;;  %v1304_v4 = vsub.f32 0.0, %v4645_v5  ;;  %v1710_v25 = vmul.f32 %v3532_v62, %v5273_v47  ;;  %3571 = vpow2.f32 %v1381_v29  ;;  %v1397_v60 = vmul.f32 1.442695, %v1292_v45  ;;  %v5275_v5 = vld [vmem:[#allocation24_spill] sm:$0xff]  ;;  %v1177_v45 = vpop.f32.mrf.mxu0 }
 0x24b   : > { %v3548_v48 = vpop.eup %3547  ;;  %v1311_v31 = vsub.f32 0.0, %v4650_v13  ;;  %v1752_v44 = vadd.f32 %v4594_v27, %v1707_v15  ;;  %v1717_v22 = vmul.f32 %v3534_v12, %v5274_v52  ;;  %v1401_v39 = vmul.f32 1.442695, %v1294_v1 }
 0x24c   : > { %v3550_v21 = vpop.eup %3549  ;;  %v1415_v38 = vmul.f32 1.442695, %v1301_v6  ;;  %v1778_v35 = vadd.f32 %v4604_v41, %v1709_v11  ;;  %v1719_v17 = vmul.f32 %v3536_v32, %v5275_v5  ;;  %v1718_v62 = vmul.f32 %v3538_v36, %v5276_v0  ;;  %v5278_v5 = vld [vmem:[#allocation29_spill] sm:$0xff] }
 0x24d   : > { %v3552_v19 = vpop.eup %3551  ;;  %v1419_v29 = vmul.f32 1.442695, %v1303_v58  ;;  %v1765_v13 = vadd.f32 %v4614_v10, %v1708_v33  ;;  %v1720_v27 = vmul.f32 %v3540_v9, %v5277_v57  ;;  %v1417_v15 = vmul.f32 1.442695, %v1302_v26  ;;  %v4688_v9 = vpop.f32.mrf.mxu1  ;;  %v5279_v33 = vld [vmem:[#allocation27_spill] sm:$0xff] }
 0x24e   : > { %v3554_v47 = vpop.eup %3553  ;;  %v4673_v12 = vmul.f32 1.442695, %v1304_v4  ;;  %v1791_v6 = vadd.f32 %v1790_v37, %v1710_v25  ;;  %v4675_v52 = vmul.f32 1.442695, %v1311_v31  ;;  %v4678_v41 = vadd.f32 %v1175_v56, %v4478_v18  ;;  %v5281_v31 = vld [vmem:[#allocation33_spill] sm:$0xff] }
 0x24f   : > { %v3556_v1 = vpop.eup %3555  ;;  %v4682_v0 = vadd.f32 %v4561_v61, %v4490_v24  ;;  %v1753_v36 = vadd.f32 %v1752_v44, %v1717_v22  ;;  %v1728_v10 = vmul.f32 %v3546_v14, %v5278_v5  ;;  %3573 = vpow2.f32 %v1395_v40  ;;  %v5280_v61 = vld [vmem:[#allocation30_spill] sm:$0xff]  ;;  %v5282_v40 = vld [vmem:[#allocation28_spill] sm:$0xff] }
 0x250   : > { %v3558_v32 = vpop.eup %3557  ;;  %v4686_v57 = vadd.f32 %v1177_v45, %v4495_v7  ;;  %v1779_v11 = vadd.f32 %v1778_v35, %v1719_v17  ;;  %v1766_v58 = vadd.f32 %v1765_v13, %v1718_v62  ;;  %v1727_v56 = vmul.f32 %v3542_v20, %v5279_v33  ;;  %v5283_v45 = vld [vmem:[#allocation31_spill] sm:$0xff]  ;;  %v5284_v17 = vld [vmem:[#allocation34_spill] sm:$0xff]  ;;  %v4696_v20 = vpop.f32.mrf.mxu1 }
 0x251   : > { %v3560_v37 = vpop.eup %3559  ;;  %3575 = vpow2.f32 %v1399_v50  ;;  %v1792_v4 = vadd.f32 %v1791_v6, %v1720_v27  ;;  %v1730_v25 = vmul.f32 %v3548_v48, %v5280_v61  ;;  %v1738_v44 = vmul.f32 %v3554_v47, %v5281_v31  ;;  %v5285_v48 = vld [vmem:[#allocation32_spill] sm:$0xff] }
 0x252   : > { %v3562_v26 = vpop.eup %3561  ;;  %3577 = vpow2.f32 %v1397_v60  ;;  %v1729_v22 = vmul.f32 %v3544_v63, %v5282_v40  ;;  %v1737_v5 = vmul.f32 %v3550_v21, %v5283_v45  ;;  %v1511_v30 = vadd.f32 1.0, %v3556_v1  ;;  %v1179_v21 = vpop.f32.mrf.mxu0 }
 0x253   : > { %v3564_v14 = vpop.eup %3563  ;;  %3579 = vpow2.f32 %v1401_v39  ;;  %v1767_v8 = vadd.f32 %v1766_v58, %v1728_v10  ;;  %v1740_v13 = vmul.f32 %v3560_v37, %v5284_v17  ;;  %v1513_v35 = vadd.f32 1.0, %v3558_v32 }
 0x254   : > { %3581 = vpow2.f32 %v1415_v38  ;;  %v3566_v50 = vpop.eup %3565  ;;  %v1754_v62 = vadd.f32 %v1753_v36, %v1727_v56  ;;  %v1739_v27 = vmul.f32 %v3552_v19, %v5285_v48  ;;  %v1512_v47 = vadd.f32 1.0, %v3562_v26  ;;  %v1181_v26 = vpop.f32.mrf.mxu0 }
 0x255   : > { %3583 = vpow2.f32 %v1419_v29  ;;  %v3568_v60 = vpop.eup %3567  ;;  %v1793_v6 = vadd.f32 %v1792_v4, %v1730_v25  ;;  %v1768_v63 = vadd.f32 %v1767_v8, %v1738_v44  ;;  %v1514_v33 = vadd.f32 1.0, %v3564_v14  ;;  %v4704_v29 = vpop.f32.mrf.mxu1 }
 0x256   : > { %3585 = vpow2.f32 %v1417_v15  ;;  %v3570_v39 = vpop.eup %3569  ;;  %v1780_v1 = vadd.f32 %v1779_v11, %v1729_v22  ;;  %v1755_v10 = vadd.f32 %v1754_v62, %v1737_v5  ;;  %v1313_v38 = vsub.f32 0.0, %v4678_v41 }
 0x257   : > { %3587 = vrcp.f32 %v1511_v30  ;;  %v3572_v32 = vpop.eup %3571  ;;  %v1794_v37 = vadd.f32 %v1793_v6, %v1740_v13  ;;  %v1521_v36 = vadd.f32 1.0, %v3566_v50  ;;  %v4702_v19 = vadd.f32 %v4582_v28, %v4449_v54  ;;  %v4717_v14 = vpop.f32.mrf.mxu1 }
 0x258   : > { %3589 = vrcp.f32 %v1513_v35  ;;  %v1781_v8 = vadd.f32 %v1780_v1, %v1739_v27  ;;  %v1523_v15 = vadd.f32 1.0, %v3568_v60  ;;  %v1312_v58 = vsub.f32 0.0, %v4682_v0  ;;  %v1185_v27 = vpop.f32.mrf.mxu0 }
 0x259   : > { %3591 = vrcp.f32 %v1512_v47  ;;  %v1769_v11 = vrot.slane %v1768_v63, 4  ;;  %v1522_v30 = vadd.f32 1.0, %v3570_v39  ;;  %v4708_v56 = vadd.f32 %v1179_v21, %v4478_v18  ;;  %v4725_v21 = vpop.f32.mrf.mxu1 }
 0x25a   : > { %3593 = vrcp.f32 %v1514_v33  ;;  %v1756_v4 = vrot.slane %v1755_v10, 4  ;;  %v1524_v61 = vadd.f32 1.0, %v3572_v32  ;;  %v1314_v28 = vsub.f32 0.0, %v4686_v57 }
 0x25b   : > { %3595 = vpow2.f32 %v4673_v12  ;;  %v1795_v25 = vrot.slane %v1794_v37, 4  ;;  %v1321_v31 = vsub.f32 0.0, %v4702_v19  ;;  %v4715_v44 = vadd.f32 %v4607_v55, %v4490_v24 }
 0x25c   : > { %3597 = vrcp.f32 %v1521_v36  ;;  %v3574_v40 = vpop.eup %3573  ;;  %v1782_v22 = vrot.slane %v1781_v8, 4  ;;  %v1439_v45 = vmul.f32 1.442695, %v1313_v38  ;;  %v4720_v5 = vadd.f32 %v1181_v26, %v4495_v7 }
 0x25d   : > { %3599 = vrcp.f32 %v1523_v15  ;;  %v1770_v17 = vadd.f32 %v1769_v11, %v1768_v63  ;;  %v1437_v13 = vmul.f32 1.442695, %v1312_v58  ;;  %v1323_v35 = vsub.f32 0.0, %v4708_v56 }
 0x25e   : > { %v3576_v12 = vpop.eup %3575  ;;  %3601 = vrcp.f32 %v1522_v30  ;;  %v1757_v62 = vadd.f32 %v1756_v4, %v1755_v10  ;;  %v1441_v55 = vmul.f32 1.442695, %v1314_v28  ;;  %v1322_v48 = vsub.f32 0.0, %v4715_v44 }
 0x25f   : > { %v3578_v50 = vpop.eup %3577  ;;  %3603 = vrcp.f32 %v1524_v61  ;;  %v1796_v60 = vadd.f32 %v1795_v25, %v1794_v37  ;;  %v1531_v6 = vadd.f32 1.0, %v3574_v40  ;;  %v1455_v33 = vmul.f32 1.442695, %v1321_v31  ;;  %v4738_v61 = vpop.f32.mrf.mxu1 }
 0x260   : > { %v3580_v47 = vpop.eup %3579  ;;  %3605 = vpow2.f32 %v4675_v52  ;;  %v1783_v39 = vadd.f32 %v1782_v22, %v1781_v8  ;;  %v1324_v1 = vsub.f32 0.0, %v4720_v5  ;;  %v4730_v10 = vadd.f32 %v4633_v42, %v4449_v54 }
 0x261   : > { %v3582_v63 = vpop.eup %3581  ;;  %3607 = vpow2.f32 %v1439_v45  ;;  %v1771_v32 = vrot.slane %v1770_v17, 2  ;;  %v1459_v36 = vmul.f32 1.442695, %v1323_v35  ;;  %v4733_v37 = vadd.f32 %v1185_v27, %v4478_v18 }
 0x262   : > { %5286 = vst [vmem:[#allocation22_spill] sm:$0xff] %v4730_v10  ;;  %v3584_v38 = vpop.eup %3583  ;;  %3609 = vpow2.f32 %v1437_v13  ;;  %v1758_v15 = vrot.slane %v1757_v62, 2  ;;  %v3921_v58 = vmov 1966171168   ;;  %v1457_v8 = vmul.f32 1.442695, %v1322_v48  ;;  %v1187_v48 = vpop.f32.mrf.mxu0 }
 0x263   : > { %5287 = vst [vmem:[#allocation23_spill] sm:$0xff] %v4733_v37  ;;  %v3586_v52 = vpop.eup %3585  ;;  %v4735_v11 = vunpack.c.l.s4 %v3921_v58  ;;  %3611 = vpow2.f32 %v1441_v55  ;;  %v1797_v26 = vrot.slane %v1796_v60, 2  ;;  %v1533_v4 = vadd.f32 1.0, %v3576_v12  ;;  %v4755_v58 = vpop.f32.mrf.mxu1 }
 0x264   : > { %v3588_v30 = vpop.eup %3587  ;;  %3613 = vrcp.f32 %v1531_v6  ;;  %v1331_v42 = vsub.f32 0.0, %v4730_v10  ;;  %v1461_v25 = vmul.f32 1.442695, %v1324_v1  ;;  %v1333_v31 = vsub.f32 0.0, %v4733_v37 }
 0x265   : > { %5288 = vst [vmem:[#allocation24_spill] sm:$0xff] %v4735_v11  ;;  %v3590_v28 = vpop.eup %3589  ;;  %3615 = vpow2.f32 %v1455_v33  ;;  %v4743_v40 = vadd.f32 %v4655_v2, %v4490_v24  ;;  %v1784_v45 = vrot.slane %v1783_v39, 2  ;;  %v1772_v13 = vadd.f32 %v1771_v32, %v1770_v17  ;;  %v737_v2 = vld [vmem:[%s5175_s4 + $0x8] sm:$0x3]  ;;  %v5291_v11 = vld [vmem:[#allocation20_spill] sm:$0xff] }
 0x266   : > { %v4745_v22 = vpop.eup %3591  ;;  %v1532_v35 = vadd.f32 1.0, %v3578_v50  ;;  %3617 = vpow2.f32 %v1459_v36  ;;  %v1534_v55 = vadd.f32 1.0, %v3580_v47  ;;  %v4749_v6 = vadd.f32 %v1758_v15, %v1757_v62 }
 0x267   : > { %5289 = vst [vmem:[#allocation25_spill] sm:$0xff] %v4743_v40  ;;  %v4747_v12 = vpop.eup %3593  ;;  %3619 = vpow2.f32 %v1457_v8  ;;  %v1475_v1 = vmul.f32 1.442695, %v1331_v42  ;;  %v1798_v50 = vadd.f32 %v1797_v26, %v1796_v60  ;;  %v1479_v32 = vmul.f32 1.442695, %v1333_v31  ;;  %v5292_v31 = vld [vmem:[#allocation21_spill] sm:$0xff] }
 0x268   : > { %v3596_v27 = vpop.eup %3595  ;;  %3621 = vrcp.f32 %v1533_v4  ;;  %v1332_v47 = vsub.f32 0.0, %v4743_v40  ;;  %v4758_v8 = vadd.f32 %v1784_v45, %v1783_v39  ;;  %v1773_v62 = vrot.slane %v1772_v13, 1  ;;  %v1189_v39 = vpop.f32.mrf.mxu0 }
 0x269   : > { %v3598_v17 = vpop.eup %3597  ;;  %3623 = vpow2.f32 %v1461_v25  ;;  %v4761_v15 = vadd.f32 %v1187_v48, %v4495_v7  ;;  %v1541_v42 = vadd.f32 1.0, %v3582_v63  ;;  %v4764_v37 = vrot.slane %v737_v2, %v5291_v11 }
 0x26a   : > { %v3600_v36 = vpop.eup %3599  ;;  %3625 = vrcp.f32 %v1532_v35  ;;  %v1477_v33 = vmul.f32 1.442695, %v1332_v47  ;;  %v1543_v26 = vadd.f32 1.0, %v3584_v38  ;;  %v4770_v45 = vrot.slane %v737_v2, %v5292_v31  ;;  %v4772_v35 = vpop.f32.mrf.mxu1 }
 0x26b   : > { %5290 = vst [vmem:[#allocation26_spill] sm:$0xff] %v4761_v15  ;;  %v3602_v4 = vpop.eup %3601  ;;  %3627 = vrcp.f32 %v1534_v55  ;;  %v1334_v25 = vsub.f32 0.0, %v4761_v15  ;;  %v1799_v63 = vrot.slane %v1798_v50, 1  ;;  %v1542_v47 = vadd.f32 1.0, %v3586_v52 }
 0x26c   : > { %v4766_v60 = vpop.eup %3603  ;;  %3629 = vpow2.f32 %v1475_v1  ;;  %v4776_v10 = vadd.f32 %v1773_v62, %v1772_v13  ;;  %v1544_v38 = vadd.f32 1.0, %v3596_v27  ;;  %v1671_v15 = vmul.f32 %v3588_v30, %v4473_v53  ;;  %v1191_v13 = vpop.f32.mrf.mxu0 }
 0x26d   : > { %v3606_v48 = vpop.eup %3605  ;;  %3631 = vpow2.f32 %v1479_v32  ;;  %v4781_v31 = vadd.f32 %v4666_v49, %v4449_v54  ;;  %v1673_v52 = vmul.f32 %v3590_v28, %v4504_v3  ;;  %v1481_v32 = vmul.f32 1.442695, %v1334_v25  ;;  %v4787_v27 = vpop.f32.mrf.mxu1 }
 0x26e   : > { %v3608_v11 = vpop.eup %3607  ;;  %3633 = vpow2.f32 %v1477_v33  ;;  %v1551_v2 = vadd.f32 1.0, %v3606_v48  ;;  %v4785_v40 = vadd.f32 %v1189_v39, %v4478_v18  ;;  %v4789_v62 = vadd.f32 %v1799_v63, %v1798_v50 }
 0x26f   : > { %v3610_v1 = vpop.eup %3609  ;;  %3635 = vrcp.f32 %v1541_v42  ;;  %v1681_v53 = vmul.f32 %v3598_v17, %v4567_v16  ;;  %v1553_v30 = vadd.f32 1.0, %v3608_v11  ;;  %v1672_v49 = vmul.f32 %v4745_v22, %v4520_v59  ;;  %v4804_v22 = vpop.f32.mrf.mxu1 }
 0x270   : > { %v3612_v55 = vpop.eup %3611  ;;  %3637 = vrcp.f32 %v1543_v26  ;;  %v1552_v3 = vadd.f32 1.0, %v3610_v1  ;;  %v4796_v18 = vadd.f32 %v4688_v9, %v4490_v24  ;;  %v1341_v50 = vsub.f32 0.0, %v4781_v31 }
 0x271   : > { %v3614_v33 = vpop.eup %3613  ;;  %3639 = vrcp.f32 %v1542_v47  ;;  %v1554_v42 = vadd.f32 1.0, %v3612_v55  ;;  %v4800_v26 = vadd.f32 %v1191_v13, %v4495_v7  ;;  %v1683_v11 = vmul.f32 %v3600_v36, %v4580_v46 }
 0x272   : > { %v3616_v54 = vpop.eup %3615  ;;  %3641 = vrcp.f32 %v1544_v38  ;;  %v1343_v59 = vsub.f32 0.0, %v4785_v40  ;;  %v1674_v24 = vmul.f32 %v4747_v12, %v4553_v51  ;;  %v1801_v9 = vadd.f32 %v1681_v53, %v1671_v15 }
 0x273   : > { %v3618_v28 = vpop.eup %3617  ;;  %3643 = vrcp.f32 %v1551_v2  ;;  %v1561_v17 = vadd.f32 1.0, %v3616_v54  ;;  %v1682_v7 = vmul.f32 %v3602_v4, %v4591_v23  ;;  %v1342_v46 = vsub.f32 0.0, %v4796_v18  ;;  %v4821_v4 = vpop.f32.mrf.mxu1 }
 0x274   : > { %v3620_v16 = vpop.eup %3619  ;;  %3645 = vpow2.f32 %v1481_v32  ;;  %v1563_v39 = vadd.f32 1.0, %v3618_v28  ;;  %v1495_v63 = vmul.f32 1.442695, %v1341_v50  ;;  %v1344_v47 = vsub.f32 0.0, %v4800_v26 }
 0x275   : > { %v3622_v25 = vpop.eup %3621  ;;  %3647 = vrcp.f32 %v1553_v30  ;;  %v1562_v55 = vadd.f32 1.0, %v3620_v16  ;;  %v4813_v38 = vadd.f32 %v4696_v20, %v4764_v37  ;;  %v4815_v12 = vadd.f32 %v1683_v11, %v1673_v52 }
 0x276   : > { %v3624_v48 = vpop.eup %3623  ;;  %3649 = vrcp.f32 %v1552_v3  ;;  %v1499_v15 = vmul.f32 1.442695, %v1343_v59  ;;  %v4819_v23 = vadd.f32 %v4704_v29, %v4770_v45  ;;  %v1684_v2 = vmul.f32 %v4766_v60, %v4598_v34 }
 0x277   : > { %v3626_v36 = vpop.eup %3625  ;;  %3651 = vrcp.f32 %v1554_v42  ;;  %v1564_v32 = vadd.f32 1.0, %v3624_v48  ;;  %v4827_v20 = vadd.f32 %v4717_v14, %v4764_v37  ;;  %v4829_v13 = vadd.f32 %v1682_v7, %v1672_v49  ;;  %v1252_v42 = vpop.f32.mrf.mxu1  ;;  %v5293_v48 = vld [vmem:[#allocation35_spill] sm:$0xff] }
 0x278   : > { %v3628_v51 = vpop.eup %3627  ;;  %3653 = vrcp.f32 %v1561_v17  ;;  %v1497_v53 = vmul.f32 1.442695, %v1342_v46  ;;  %v4833_v29 = vadd.f32 %v4725_v21, %v4770_v45  ;;  %v1691_v54 = vmul.f32 %v3614_v33, %v4602_v43 }
 0x279   : > { %v3630_v1 = vpop.eup %3629  ;;  %3655 = vrcp.f32 %v1563_v39  ;;  %v1501_v34 = vmul.f32 1.442695, %v1344_v47  ;;  %v1275_v60 = vsub.f32 0.0, %v4813_v38  ;;  %v1276_v14 = vsub.f32 0.0, %v4819_v23 }
 0x27a   : > { %v3632_v52 = vpop.eup %3631  ;;  %3657 = vrcp.f32 %v1562_v55  ;;  %v1571_v28 = vadd.f32 1.0, %v3630_v1  ;;  %v4840_v49 = vadd.f32 %v4738_v61, %v4764_v37  ;;  %v1285_v16 = vsub.f32 0.0, %v4827_v20 }
 0x27b   : > { %v3634_v30 = vpop.eup %3633  ;;  %3659 = vpow2.f32 %v1495_v63  ;;  %v1573_v21 = vadd.f32 1.0, %v3632_v52  ;;  %v4845_v43 = vadd.f32 %v4755_v58, %v4770_v45  ;;  %v1286_v17 = vsub.f32 0.0, %v4833_v29 }
 0x27c   : > { %v3636_v3 = vpop.eup %3635  ;;  %3661 = vpow2.f32 %v1499_v15  ;;  %v1572_v11 = vadd.f32 1.0, %v3634_v30  ;;  %v4850_v59 = vadd.f32 %v4772_v35, %v4764_v37  ;;  %v1840_v39 = vadd.f32 %v1684_v2, %v1674_v24  ;;  %v1254_v15 = vpop.f32.mrf.mxu1 }
 0x27d   : > { %v3638_v50 = vpop.eup %3637  ;;  %3663 = vrcp.f32 %v1564_v32  ;;  %v1693_v7 = vmul.f32 %v3622_v25, %v5293_v48  ;;  %v1363_v55 = vmul.f32 1.442695, %v1275_v60  ;;  %v1802_v63 = vadd.f32 %v1801_v9, %v1691_v54  ;;  %v5294_v25 = vld [vmem:[#allocation36_spill] sm:$0xff]  ;;  %v5295_v54 = vld [vmem:[#allocation37_spill] sm:$0xff]  ;;  %v5296_v60 = vld [vmem:[#allocation38_spill] sm:$0xff] }
 0x27e   : > { %v3640_v33 = vpop.eup %3639  ;;  %3665 = vpow2.f32 %v1497_v53  ;;  %v1365_v58 = vmul.f32 1.442695, %v1276_v14  ;;  %v1295_v47 = vsub.f32 0.0, %v4840_v49  ;;  %v1383_v32 = vmul.f32 1.442695, %v1285_v16 }
 0x27f   : > { %v4852_v61 = vpop.eup %3641  ;;  %3667 = vpow2.f32 %v1501_v34  ;;  %v1296_v35 = vsub.f32 0.0, %v4845_v43  ;;  %v4859_v52 = vadd.f32 %v4787_v27, %v4770_v45  ;;  %v1692_v2 = vmul.f32 %v3626_v36, %v5294_v25 }
 0x280   : > { %v3644_v46 = vpop.eup %3643  ;;  %3669 = vrcp.f32 %v1571_v28  ;;  %v1385_v53 = vmul.f32 1.442695, %v1286_v17  ;;  %v1305_v9 = vsub.f32 0.0, %v4850_v59  ;;  %v1694_v34 = vmul.f32 %v3628_v51, %v5295_v54  ;;  %v5301_v54 = vld [vmem:[#allocation40_spill] sm:$0xff] }
 0x281   : > { %v3646_v1 = vpop.eup %3645  ;;  %3671 = vrcp.f32 %v1573_v21  ;;  %v1701_v28 = vmul.f32 %v3636_v3, %v5296_v60  ;;  %v1828_v16 = vadd.f32 %v4815_v12, %v1693_v7  ;;  %v1403_v27 = vmul.f32 1.442695, %v1295_v47 }
 0x282   : > { %v3648_v24 = vpop.eup %3647  ;;  %3673 = vrcp.f32 %v1572_v11  ;;  %v1574_v14 = vadd.f32 1.0, %v3646_v1  ;;  %v4870_v36 = vadd.f32 %v4804_v22, %v4764_v37  ;;  %v1258_v11 = vpop.f32.mrf.mxu1  ;;  %v1405_v48 = vmul.f32 1.442695, %v1296_v35 }
 0x283   : > { %v3650_v30 = vpop.eup %3649  ;;  %3675 = vpow2.f32 %v1363_v55  ;;  %v1306_v51 = vsub.f32 0.0, %v4859_v52  ;;  %v4877_v3 = vadd.f32 %v4821_v4, %v4770_v45  ;;  %v1815_v12 = vadd.f32 %v4829_v13, %v1692_v2 }
 0x284   : > { %v4865_v21 = vpop.eup %3651  ;;  %3677 = vpow2.f32 %v1365_v58  ;;  %5297 = vst [vmem:[#allocation29_spill] sm:$0xff] %v4870_v36  ;;  %v1423_v7 = vmul.f32 1.442695, %v1305_v9  ;;  %v4883_v22 = vadd.f32 %v1252_v42, %v4764_v37  ;;  %v1841_v47 = vadd.f32 %v1840_v39, %v1694_v34  ;;  %v1260_v2 = vpop.f32.mrf.mxu1 }
 0x285   : > { %v4872_v17 = vpop.eup %3653  ;;  %3679 = vpow2.f32 %v1383_v32  ;;  %5298 = vst [vmem:[#allocation27_spill] sm:$0xff] %v4877_v3  ;;  %v1803_v1 = vadd.f32 %v1802_v63, %v1701_v28  ;;  %v5300_v32 = vld [vmem:[#allocation39_spill] sm:$0xff]  ;;  %v1702_v4 = vmul.f32 %v3640_v33, %v5301_v54  ;;  %v1315_v60 = vsub.f32 0.0, %v4870_v36  ;;  %v5303_v33 = vld [vmem:[#allocation41_spill] sm:$0xff] }
 0x286   : > { %v4879_v55 = vpop.eup %3655  ;;  %3681 = vpow2.f32 %v1385_v53  ;;  %5299 = vst [vmem:[#allocation30_spill] sm:$0xff] %v4883_v22  ;;  %v1703_v35 = vmul.f32 %v3638_v50, %v5300_v32  ;;  %v4891_v13 = vadd.f32 %v1254_v15, %v4770_v45  ;;  %v1425_v9 = vmul.f32 1.442695, %v1306_v51 }
 0x287   : > { %v4885_v58 = vpop.eup %3657  ;;  %3683 = vrcp.f32 %v1574_v14  ;;  %v1316_v39 = vsub.f32 0.0, %v4877_v3  ;;  %v1325_v50 = vsub.f32 0.0, %v4883_v22  ;;  %v1704_v14 = vmul.f32 %v4852_v61, %v5303_v33 }
 0x288   : > { %v3660_v25 = vpop.eup %3659  ;;  %3685 = vpow2.f32 %v1403_v27  ;;  %5302 = vst [vmem:[#allocation33_spill] sm:$0xff] %v4891_v13  ;;  %v5304_v27 = vld [vmem:[#allocation42_spill] sm:$0xff]  ;;  %v5305_v15 = vlaneseq  ;;  %v5306_v54 = vmov 0  ;;  %v5230_v22 = vmov 0.0  }
 0x289   : > { %v3662_v53 = vpop.eup %3661  ;;  %v1581_v42 = vadd.f32 1.0, %v3660_v25  ;;  %3687 = vpow2.f32 %v1405_v48  ;;  %v1711_v32 = vmul.f32 %v3644_v46, %v5304_v27  ;;  %v1443_v25 = vmul.f32 1.442695, %v1315_v60 }
 0x28a   : > { %v3664_v63 = vpop.eup %3663  ;;  %v1583_v34 = vadd.f32 1.0, %v3662_v53  ;;  %3689 = vpow2.f32 %v1423_v7  ;;  %vm4899_vm1 = vcmp.lt.s32.totalorder %v5305_v15, 256  ;;  %v1326_v7 = vsub.f32 0.0, %v4891_v13  ;;  %v1262_v53 = vpop.f32.mrf.mxu1 }
 0x28b   : > { %v3666_v28 = vpop.eup %3665  ;;  %3691 = vrcp.f32 %v1581_v42  ;;  %v5307_v54 = vsel %vm4899_vm1, 4294967295, %v5306_v54  ;;  %534 = vst.msk [vmem:[#allocation2 + $0x8] sm:$0x3] %vm4899_vm1, %v5230_v22  ;;  %v1713_v46 = vmul.f32 %v3648_v24, %v4678_v41  ;;  %v1445_v33 = vmul.f32 1.442695, %v1316_v39 }
 0x28c   : > { %5308 = vst [vmem:[#allocation28_spill] sm:$0xff] %v5307_v54  ;;  %v3668_v48 = vpop.eup %3667  ;;  %3693 = vrcp.f32 %v1583_v34  ;;  %v1582_v51 = vadd.f32 1.0, %v3666_v28  ;;  %v1829_v15 = vadd.f32 %v1828_v16, %v1703_v35  ;;  %v1712_v34 = vmul.f32 %v3650_v30, %v4682_v0 }
 0x28d   : > { %v3670_v61 = vpop.eup %3669  ;;  %v1584_v42 = vadd.f32 1.0, %v3668_v48  ;;  %3695 = vpow2.f32 %v1425_v9  ;;  %v1463_v60 = vmul.f32 1.442695, %v1325_v50  ;;  %v1816_v13 = vadd.f32 %v1815_v12, %v1702_v4  ;;  %v1264_v9 = vpop.f32.mrf.mxu1 }
 0x28e   : > { %v3672_v27 = vpop.eup %3671  ;;  %3697 = vrcp.f32 %v1582_v51  ;;  %v1842_v3 = vadd.f32 %v1841_v47, %v1704_v14  ;;  %v4910_v36 = vadd.f32 %v1258_v11, %v4764_v37  ;;  %v1804_v54 = vadd.f32 %v1803_v1, %v1711_v32  ;;  %v5309_v14 = vld [vmem:[#allocation22_spill] sm:$0xff] }
 0x28f   : > { %v3674_v28 = vpop.eup %3673  ;;  %3699 = vrcp.f32 %v1584_v42  ;;  %v1465_v41 = vmul.f32 1.442695, %v1326_v7  ;;  %v4913_v24 = vadd.f32 %v1260_v2, %v4770_v45  ;;  %v1830_v35 = vadd.f32 %v1829_v15, %v1713_v46 }
 0x290   : > { %v3676_v22 = vpop.eup %3675  ;;  %3701 = vpow2.f32 %v1443_v25  ;;  %v1714_v0 = vmul.f32 %v4865_v21, %v4686_v57  ;;  %v1721_v30 = vmul.f32 %v4872_v17, %v4702_v19  ;;  %v1817_v11 = vadd.f32 %v1816_v13, %v1712_v34  ;;  %v5312_v34 = vld [vmem:[#allocation26_spill] sm:$0xff] }
 0x291   : > { %v3678_v16 = vpop.eup %3677  ;;  %3703 = vpow2.f32 %v1445_v33  ;;  %v1723_v47 = vmul.f32 %v4879_v55, %v4708_v56  ;;  %v4922_v1 = vadd.f32 %v1262_v53, %v4764_v37  ;;  %v1722_v2 = vmul.f32 %v4885_v58, %v4715_v44  ;;  %v5310_v58 = vld [vmem:[#allocation23_spill] sm:$0xff]  ;;  %v5311_v53 = vld [vmem:[#allocation25_spill] sm:$0xff] }
 0x292   : > { %v3680_v12 = vpop.eup %3679  ;;  %3705 = vpow2.f32 %v1463_v60  ;;  %v1515_v39 = vadd.f32 1.0, %v3676_v22  ;;  %v1335_v57 = vsub.f32 0.0, %v4910_v36  ;;  %v4928_v21 = vadd.f32 %v1264_v9, %v4770_v45 }
 0x293   : > { %v3682_v4 = vpop.eup %3681  ;;  %v1724_v17 = vmul.f32 %v3664_v63, %v4720_v5  ;;  %v1516_v13 = vadd.f32 1.0, %v3678_v16  ;;  %3707 = vpow2.f32 %v1465_v41  ;;  %v1336_v56 = vsub.f32 0.0, %v4913_v24 }
 0x294   : > { %v3684_v19 = vpop.eup %3683  ;;  %v1843_v37 = vadd.f32 %v1842_v3, %v1714_v0  ;;  %v1805_v50 = vadd.f32 %v1804_v54, %v1721_v30  ;;  %v1731_v32 = vmul.f32 %v3670_v61, %v5309_v14  ;;  %v1525_v48 = vadd.f32 1.0, %v3680_v12 }
 0x295   : > { %v3686_v55 = vpop.eup %3685  ;;  %v1831_v22 = vadd.f32 %v1830_v35, %v1723_v47  ;;  %v1733_v51 = vmul.f32 %v3672_v27, %v5310_v58  ;;  %v1526_v25 = vadd.f32 1.0, %v3682_v4  ;;  %v1345_v45 = vsub.f32 0.0, %v4922_v1 }
 0x296   : > { %v3688_v44 = vpop.eup %3687  ;;  %v1732_v5 = vmul.f32 %v3674_v28, %v5311_v53  ;;  %3709 = vrcp.f32 %v1515_v39  ;;  %v1483_v63 = vmul.f32 1.442695, %v1335_v57  ;;  %v1346_v46 = vsub.f32 0.0, %v4928_v21 }
 0x297   : > { %v3690_v7 = vpop.eup %3689  ;;  %v1818_v3 = vadd.f32 %v1817_v11, %v1722_v2  ;;  %v1844_v54 = vadd.f32 %v1843_v37, %v1724_v17  ;;  %3711 = vrcp.f32 %v1516_v13  ;;  %v1485_v61 = vmul.f32 1.442695, %v1336_v56 }
 0x298   : > { %v3692_v42 = vpop.eup %3691  ;;  %v1806_v15 = vadd.f32 %v1805_v50, %v1731_v32  ;;  %v1734_v60 = vmul.f32 %v3684_v19, %v5312_v34  ;;  %3713 = vrcp.f32 %v1525_v48  ;;  %v1832_v9 = vadd.f32 %v1831_v22, %v1733_v51 }
 0x299   : > { %v3694_v33 = vpop.eup %3693  ;;  %v1741_v27 = vmul.f32 %v3692_v42, %v4781_v31  ;;  %3715 = vrcp.f32 %v1526_v25  ;;  %v1503_v16 = vmul.f32 1.442695, %v1345_v45  ;;  %v1819_v0 = vadd.f32 %v1818_v3, %v1732_v5 }
 0x29a   : > { %v3696_v41 = vpop.eup %3695  ;;  %v1743_v28 = vmul.f32 %v3694_v33, %v4785_v40  ;;  %3717 = vpow2.f32 %v1483_v63  ;;  %v1505_v12 = vmul.f32 1.442695, %v1346_v46  ;;  %v1535_v2 = vadd.f32 1.0, %v3686_v55 }
 0x29b   : > { %v3698_v35 = vpop.eup %3697  ;;  %v1807_v30 = vadd.f32 %v1806_v15, %v1741_v27  ;;  %3719 = vpow2.f32 %v1485_v61  ;;  %v1845_v31 = vadd.f32 %v1844_v54, %v1734_v60  ;;  %v1536_v17 = vadd.f32 1.0, %v3688_v44  ;;  %v5315_v60 = vld [vmem:[#allocation19_spill] sm:$0xff]  ;;  %v5316_v27 = vld [vmem:[#allocation24_spill] sm:$0xff] }
 0x29c   : > { %v3700_v11 = vpop.eup %3699  ;;  %v1833_v47 = vadd.f32 %v1832_v9, %v1743_v28  ;;  %v1742_v4 = vmul.f32 %v3698_v35, %v4796_v18  ;;  %v1545_v37 = vadd.f32 1.0, %v3690_v7  ;;  %3721 = vpow2.f32 %v1503_v16 }
 0x29d   : > { %v3702_v39 = vpop.eup %3701  ;;  %v1808_v57 = vrot.slane %v1807_v30, 4  ;;  %v1744_v19 = vmul.f32 %v3700_v11, %v4800_v26  ;;  %v1546_v48 = vadd.f32 1.0, %v3696_v41  ;;  %3723 = vpow2.f32 %v1505_v12 }
 0x29e   : > { %v3704_v40 = vpop.eup %3703  ;;  %v1834_v13 = vrot.slane %v1833_v47, 4  ;;  %v1820_v56 = vadd.f32 %v1819_v0, %v1742_v4  ;;  %3725 = vrcp.f32 %v1535_v2  ;;  %v1555_v55 = vadd.f32 1.0, %v3702_v39 }
 0x29f   : > { %v3706_v50 = vpop.eup %3705  ;;  %v1809_v14 = vadd.f32 %v1808_v57, %v1807_v30  ;;  %v1846_v32 = vadd.f32 %v1845_v31, %v1744_v19  ;;  %3727 = vrcp.f32 %v1536_v17  ;;  %v1556_v26 = vadd.f32 1.0, %v3704_v40 }
 0x2a0   : > { %v1835_v22 = vadd.f32 %v1834_v13, %v1833_v47  ;;  %v1821_v18 = vrot.slane %v1820_v56, 4  ;;  %v3708_v58 = vpop.eup %3707  ;;  %3729 = vrcp.f32 %v1545_v37  ;;  %v1565_v53 = vadd.f32 1.0, %v3706_v50 }
 0x2a1   : > { %v1810_v51 = vrot.slane %v1809_v14, 2  ;;  %v1847_v25 = vrot.slane %v1846_v32, 4  ;;  %3731 = vrcp.f32 %v1546_v48  ;;  %v1566_v63 = vadd.f32 1.0, %v3708_v58 }
 0x2a2   : > { %v1836_v44 = vrot.slane %v1835_v22, 2  ;;  %v1822_v45 = vadd.f32 %v1821_v18, %v1820_v56  ;;  %v5313_v42 = vrot.slane %v4749_v6, 1  ;;  %3733 = vrcp.f32 %v1555_v55 }
 0x2a3   : > { %v1811_v7 = vadd.f32 %v1810_v51, %v1809_v14  ;;  %v1848_v5 = vadd.f32 %v1847_v25, %v1846_v32  ;;  %v3710_v46 = vpop.eup %3709  ;;  %v5314_v15 = vrot.slane %v4758_v8, 1  ;;  %v5317_v41 = vunpack.c.0.s8 %v5316_v27 }
 0x2a4   : > { %v1761_v3 = vadd.f32 %v5313_v42, %v4749_v6  ;;  %v1837_v54 = vadd.f32 %v1836_v44, %v1835_v22  ;;  %v1823_v61 = vrot.slane %v1822_v45, 2  ;;  %v3712_v33 = vpop.eup %3711  ;;  %3735 = vrcp.f32 %v1556_v26 }
 0x2a5   : > { %v1787_v34 = vadd.f32 %v5314_v15, %v4758_v8  ;;  %v4951_v9 = vsub.s32 %v5317_v41, %v5315_v60  ;;  %v1849_v28 = vrot.slane %v1848_v5, 2  ;;  %v3714_v16 = vpop.eup %3713  ;;  %v1812_v0 = vrot.slane %v1811_v7, 1  ;;  %v5318_v41 = vld [vmem:[#allocation29_spill] sm:$0xff] }
 0x2a6   : > { %v1889_v35 = vcombine.low %v1761_v3, %v4776_v10  ;;  %v1824_v6 = vadd.f32 %v1823_v61, %v1822_v45  ;;  %3737 = vrcp.f32 %v1565_v53  ;;  %v3716_v30 = vpop.eup %3715  ;;  %v1838_v11 = vrot.slane %v1837_v54, 1 }
 0x2a7   : > { %v1890_v12 = vcombine.low %v1787_v34, %v4789_v62  ;;  %v1850_v47 = vadd.f32 %v1849_v28, %v1848_v5  ;;  %3739 = vrcp.f32 %v1566_v63  ;;  %v3718_v8 = vpop.eup %3717  ;;  %v1813_v19 = vadd.f32 %v1812_v0, %v1811_v7  ;;  %v5320_v0 = vld [vmem:[#allocation30_spill] sm:$0xff] }
 0x2a8   : > { %v1825_v4 = vrot.slane %v1824_v6, 1  ;;  %v3720_v2 = vpop.eup %3719  ;;  %v1575_v31 = vadd.f32 1.0, %v3718_v8  ;;  %v1899_v57 = vrot.slane %v1889_v35, %v4951_v9  ;;  %v1839_v56 = vadd.f32 %v1838_v11, %v1837_v54 }
 0x2a9   : > { %v1851_v39 = vrot.slane %v1850_v47, 1  ;;  %v1576_v40 = vadd.f32 1.0, %v3720_v2  ;;  %v3722_v10 = vpop.eup %3721  ;;  %v1906_v13 = vrot.slane %v1890_v12, %v4951_v9  ;;  %v1685_v58 = vmul.f32 %v3714_v16, %v4827_v20 }
 0x2aa   : > { %v1826_v17 = vadd.f32 %v1825_v4, %v1824_v6  ;;  %3741 = vrcp.f32 %v1575_v31  ;;  %v3724_v62 = vpop.eup %3723  ;;  %v1585_v14 = vadd.f32 1.0, %v3722_v10  ;;  %v1686_v44 = vmul.f32 %v3716_v30, %v4833_v29  ;;  %v5321_v30 = vld [vmem:[#allocation33_spill] sm:$0xff] }
 0x2ab   : > { %v1852_v37 = vadd.f32 %v1851_v39, %v1850_v47  ;;  %3743 = vrcp.f32 %v1576_v40  ;;  %v3726_v32 = vpop.eup %3725  ;;  %v1586_v22 = vadd.f32 1.0, %v3724_v62  ;;  %v1921_v25 = vcombine.low %v1899_v57, %v1906_v13 }
 0x2ac   : > { %v1891_v50 = vcombine.low %v1813_v19, %v1826_v17  ;;  %v3728_v18 = vpop.eup %3727  ;;  %3745 = vrcp.f32 %v1585_v14  ;;  %v1675_v53 = vmul.f32 %v3710_v46, %v4813_v38  ;;  %v1695_v7 = vmul.f32 %v3726_v32, %v4840_v49  ;;  %v5322_v17 = vld [vmem:[#allocation21_spill] sm:$0xff]  ;;  %v2049_v32 = vld [vmem:[#allocation6 + $0x278] sm:$0xff] }
 0x2ad   : > { %v1892_v48 = vcombine.low %v1839_v56, %v1852_v37  ;;  %v3730_v51 = vpop.eup %3729  ;;  %3747 = vrcp.f32 %v1586_v22  ;;  %v1676_v42 = vmul.f32 %v3712_v33, %v4819_v23  ;;  %v1696_v3 = vmul.f32 %v3728_v18, %v4845_v43  ;;  %v5319_v33 = vld [vmem:[#allocation27_spill] sm:$0xff]  ;;  %v5324_v56 = vld [vmem:[#allocation20_spill] sm:$0xff] }
 0x2ae   : > { %v1913_v55 = vrot.slane %v1891_v50, %v4951_v9  ;;  %v3732_v45 = vpop.eup %3731  ;;  %v1853_v54 = vadd.f32 %v1685_v58, %v1675_v53  ;;  %v1705_v61 = vmul.f32 %v3730_v51, %v4850_v59  ;;  %v1929_v34 = vrot.slane %v1921_v25, %v4951_v9  ;;  %v2048_v53 = vld [vmem:[#allocation6 + $0x270] sm:$0xff] }
 0x2af   : > { %v1920_v26 = vrot.slane %v1892_v48, %v4951_v9  ;;  %v3734_v5 = vpop.eup %3733  ;;  %v1866_v27 = vadd.f32 %v1686_v44, %v1676_v42  ;;  %v1706_v38 = vmul.f32 %v3732_v45, %v4859_v52  ;;  %v5323_v10 = vsub.s32 3, %v5315_v60  ;;  %v2081_v48 = vld [vmem:[#allocation6 + $0x378] sm:$0xff] }
 0x2b0   : > { %v1854_v49 = vadd.f32 %v1853_v54, %v1695_v7  ;;  %v1715_v28 = vmul.f32 %v3734_v5, %v5318_v41  ;;  %v5325_v14 = vsub.s32 2, %v5315_v60  ;;  %v5326_v51 = vsub.s32 5, %v5315_v60  ;;  %v2063_v5 = vld [vmem:[#allocation6 + $0x2e8] sm:$0xff] }
 0x2b1   : > { %v1922_v63 = vcombine.low %v1913_v55, %v1920_v26  ;;  %v3736_v20 = vpop.eup %3735  ;;  %v1867_v23 = vadd.f32 %v1866_v27, %v1696_v3  ;;  %v2064_v55 = vld [vmem:[#allocation6 + $0x2f0] sm:$0xff]  ;;  %v5327_v44 = vsub.s32 7, %v5315_v60  ;;  %v2047_v3 = vld [vmem:[#allocation6 + $0x268] sm:$0xff]  ;;  %v2078_v27 = vld [vmem:[#allocation6 + $0x360] sm:$0xff] }
 0x2b2   : > { %v1716_v43 = vmul.f32 %v3736_v20, %v5319_v33  ;;  %v1855_v35 = vadd.f32 %v1854_v49, %v1705_v61  ;;  %v2079_v20 = vld [vmem:[#allocation6 + $0x368] sm:$0xff]  ;;  %v2062_v61 = vld [vmem:[#allocation6 + $0x2e0] sm:$0xff]  ;;  %v2093_v49 = vld [vmem:[#allocation6 + $0x3d8] sm:$0xff] }
 0x2b3   : > { %v3738_v15 = vpop.eup %3737  ;;  %v1936_v29 = vrot.slane %v1922_v63, %v4951_v9  ;;  %v1868_v59 = vadd.f32 %v1867_v23, %v1706_v38  ;;  %v2095_v63 = vld [vmem:[#allocation6 + $0x3e8] sm:$0xff]  ;;  %v2060_v33 = vld [vmem:[#allocation6 + $0x2d0] sm:$0xff] }
 0x2b4   : > { %v3740_v46 = vpop.eup %3739  ;;  %v1725_v6 = vmul.f32 %v3738_v15, %v5320_v0  ;;  %v1856_v47 = vadd.f32 %v1855_v35, %v1715_v28  ;;  %v2094_v15 = vld [vmem:[#allocation6 + $0x3e0] sm:$0xff]  ;;  %v2045_v28 = vld [vmem:[#allocation6 + $0x258] sm:$0xff]  ;;  %v2044_v0 = vld [vmem:[#allocation6 + $0x250] sm:$0xff] }
 0x2b5   : > { %v1937_v16 = vcombine.low %v1929_v34, %v1936_v29  ;;  %v1726_v12 = vmul.f32 %v3740_v46, %v5321_v30  ;;  %v1869_v4 = vadd.f32 %v1868_v59, %v1716_v43  ;;  %v2046_v29 = vld [vmem:[#allocation6 + $0x260] sm:$0xff]  ;;  %v2061_v46 = vld [vmem:[#allocation6 + $0x2d8] sm:$0xff]  ;;  %v2092_v43 = vld [vmem:[#allocation6 + $0x3d0] sm:$0xff] }
 0x2b6   : > { %v1857_v39 = vadd.f32 %v1856_v47, %v1725_v6  ;;  %v2076_v6 = vld [vmem:[#allocation6 + $0x350] sm:$0xff]  ;;  %v2059_v30 = vld [vmem:[#allocation6 + $0x2c8] sm:$0xff] }
 0x2b7   : > { %v3742_v11 = vpop.eup %3741  ;;  %v4974_v2 = vmul.f32 0.015625, %v1937_v16  ;;  %v1870_v19 = vadd.f32 %v1869_v4, %v1726_v12  ;;  %v2077_v16 = vld [vmem:[#allocation6 + $0x358] sm:$0xff]  ;;  %v2091_v12 = vld [vmem:[#allocation6 + $0x3c8] sm:$0xff]  ;;  %v2058_v4 = vld [vmem:[#allocation6 + $0x2c0] sm:$0xff] }
 0x2b8   : > { %v3744_v8 = vpop.eup %3743  ;;  %v1735_v52 = vmul.f32 %v3742_v11, %v4910_v36  ;;  %v2043_v47 = vld [vmem:[#allocation6 + $0x248] sm:$0xff] }
 0x2b9   : > { %v1736_v31 = vmul.f32 %v3744_v8, %v4913_v24  ;;  %v3746_v57 = vpop.eup %3745  ;;  %v2140_v40 = vrot.slane %v4974_v2, %v5322_v17  ;;  %v2148_v13 = vrot.slane %v4974_v2, %v5323_v10  ;;  %v2136_v37 = vrot.slane %v4974_v2, %v5324_v56  ;;  %v2075_v8 = vld [vmem:[#allocation6 + $0x348] sm:$0xff]  ;;  %v2089_v10 = vld [vmem:[#allocation6 + $0x3b8] sm:$0xff] }
 0x2ba   : > { %v3748_v62 = vpop.eup %3747  ;;  %v1858_v50 = vadd.f32 %v1857_v39, %v1735_v52  ;;  %v1745_v36 = vmul.f32 %v3746_v57, %v4922_v1  ;;  %v2144_v24 = vrot.slane %v4974_v2, %v5325_v14  ;;  %v2156_v25 = vrot.slane %v4974_v2, %v5326_v51  ;;  %v2096_v1 = vld [vmem:[#allocation6 + $0x3f0] sm:$0xff]  ;;  %v2090_v52 = vld [vmem:[#allocation6 + $0x3c0] sm:$0xff]  ;;  %v2071_v51 = vld [vmem:[#allocation6 + $0x328] sm:$0xff] }
 0x2bb   : > { %v1871_v22 = vadd.f32 %v1870_v19, %v1736_v31  ;;  %v1746_v18 = vmul.f32 %v3748_v62, %v4928_v21  ;;  %2247 = vmatprep.mubr.f32.mxu0 %v2140_v40  ;;  %2317 = vmatprep.mubr.f32.mxu1 %v2148_v13  ;;  %v2164_v45 = vrot.slane %v4974_v2, %v5327_v44  ;;  %v2080_v21 = vld [vmem:[#allocation6 + $0x370] sm:$0xff]  ;;  %v2042_v57 = vld [vmem:[#allocation6 + $0x240] sm:$0xff]  ;;  %v2057_v40 = vld [vmem:[#allocation6 + $0x2b8] sm:$0xff] }
 0x2bc   : > { %v1859_v58 = vadd.f32 %v1858_v50, %v1745_v36  ;;  %2248 = vmatmul.mubr.f32.vlgmr.msra.gmra.mxu0 %v2136_v37  ;;  %2318 = vmatmul.mubr.f32.vlgmr.msra.gmra.mxu1 %v2144_v24  ;;  %v2074_v19 = vld [vmem:[#allocation6 + $0x340] sm:$0xff]  ;;  %v2041_v37 = vld [vmem:[#allocation6 + $0x238] sm:$0xff]  ;;  %v2056_v50 = vld [vmem:[#allocation6 + $0x2b0] sm:$0xff] }
 0x2bd   : > { %v1872_v26 = vadd.f32 %v1871_v22, %v1746_v18  ;;  %3058 = vmatpush3.msra.mxu0 %v2049_v32  ;;  %3093 = vmatpush3.msra.mxu1 %v2081_v48  ;;  %v2073_v62 = vld [vmem:[#allocation6 + $0x338] sm:$0xff]  ;;  %v2088_v36 = vld [vmem:[#allocation6 + $0x3b0] sm:$0xff]  ;;  %v1748_v48 = vld [vmem:[#allocation2 + $0x8] sm:$0x3] }
 0x2be   : > { %v1860_v7 = vrot.slane %v1859_v58, 4  ;;  %3059 = vmatprep.subr.mxu0 %v2064_v55  ;;  %2387 = vmatprep.mubr.f32.mxu0 %v2156_v25  ;;  %v2040_v24 = vld [vmem:[#allocation6 + $0x230] sm:$0xff]  ;;  %v2055_v22 = vld [vmem:[#allocation6 + $0x2a8] sm:$0xff]  ;;  %v2054_v25 = vld [vmem:[#allocation6 + $0x2a0] sm:$0xff] }
 0x2bf   : > { %v1873_v42 = vrot.slane %v1872_v26, 4  ;;  %3094 = vmatprep.subr.mxu1 %v2096_v1  ;;  %2457 = vmatprep.mubr.f32.mxu1 %v2164_v45  ;;  %v2072_v32 = vld [vmem:[#allocation6 + $0x330] sm:$0xff]  ;;  %v2087_v18 = vld [vmem:[#allocation6 + $0x3a8] sm:$0xff]  ;;  %v2086_v1 = vld [vmem:[#allocation6 + $0x3a0] sm:$0xff] }
 0x2c0   : > { %v1861_v54 = vadd.f32 %v1860_v7, %v1859_v58  ;;  %3060 = vmatpush3.msra.mxu0 %v2048_v53  ;;  %3095 = vmatpush3.msra.mxu1 %v2080_v21  ;;  %v2039_v58 = vld [vmem:[#allocation6 + $0x228] sm:$0xff]  ;;  %v2038_v44 = vld [vmem:[#allocation6 + $0x220] sm:$0xff]  ;;  %v2053_v53 = vld [vmem:[#allocation6 + $0x298] sm:$0xff] }
 0x2c1   : > { %v1874_v34 = vadd.f32 %v1873_v42, %v1872_v26  ;;  %3061 = vmatprep.subr.mxu0 %v2063_v5  ;;  %3096 = vmatprep.subr.mxu1 %v2095_v63  ;;  %v2070_v45 = vld [vmem:[#allocation6 + $0x320] sm:$0xff]  ;;  %v2085_v21 = vld [vmem:[#allocation6 + $0x398] sm:$0xff]  ;;  %v2052_v63 = vld [vmem:[#allocation6 + $0x290] sm:$0xff] }
 0x2c2   : > { %v1862_v38 = vrot.slane %v1861_v54, 2  ;;  %3062 = vmatpush3.msra.mxu0 %v2047_v3  ;;  %3097 = vmatpush3.msra.mxu1 %v2079_v20  ;;  %v2069_v5 = vld [vmem:[#allocation6 + $0x318] sm:$0xff]  ;;  %v2084_v42 = vld [vmem:[#allocation6 + $0x390] sm:$0xff] }
 0x2c3   : > { %v1875_v41 = vrot.slane %v1874_v34, 2  ;;  %3063 = vmatprep.subr.mxu0 %v2062_v61  ;;  %3098 = vmatprep.subr.mxu1 %v2094_v15  ;;  %v2036_v3 = vld [vmem:[#allocation6 + $0x210] sm:$0xff]  ;;  %v2083_v61 = vld [vmem:[#allocation6 + $0x388] sm:$0xff]  ;;  %v2545_v7 = vld [vmem:[%s5179_s8 + $0x58] sm:$0xff] }
 0x2c4   : > { %v1863_v23 = vadd.f32 %v1862_v38, %v1861_v54  ;;  %3064 = vmatpush3.msra.mxu0 %v2046_v29  ;;  %3099 = vmatpush3.msra.mxu1 %v2078_v27  ;;  %v2068_v20 = vld [vmem:[#allocation6 + $0x310] sm:$0xff]  ;;  %v2051_v54 = vld [vmem:[#allocation6 + $0x288] sm:$0xff]  ;;  %v2050_v29 = vld [vmem:[#allocation6 + $0x280] sm:$0xff] }
 0x2c5   : > { %v1876_v35 = vadd.f32 %v1875_v41, %v1874_v34  ;;  %3065 = vmatprep.subr.mxu0 %v2061_v46  ;;  %3100 = vmatprep.subr.mxu1 %v2093_v49  ;;  %v2035_v15 = vld [vmem:[#allocation6 + $0x208] sm:$0xff]  ;;  %v2082_v27 = vld [vmem:[#allocation6 + $0x380] sm:$0xff]  ;;  %v5329_v41 = vsub.s32 4, %v5315_v60 }
 0x2c6   : > { %v1864_v59 = vrot.slane %v1863_v23, 1  ;;  %3066 = vmatpush3.msra.mxu0 %v2045_v28  ;;  %3101 = vmatpush3.msra.mxu1 %v2077_v16  ;;  %v2067_v34 = vld [vmem:[#allocation6 + $0x308] sm:$0xff]  ;;  %v2034_v38 = vld [vmem:[#allocation6 + $0x200] sm:$0xff]  ;;  %v5330_v16 = vsub.s32 6, %v5315_v60 }
 0x2c7   : > { %v1877_v11 = vrot.slane %v1876_v35, 1  ;;  %3067 = vmatprep.subr.mxu0 %v2060_v33  ;;  %3102 = vmatprep.subr.mxu1 %v2092_v43  ;;  %v2066_v46 = vld [vmem:[#allocation6 + $0x300] sm:$0xff]  ;;  %v2152_v28 = vrot.slane %v4974_v2, %v5329_v41  ;;  %v2129_v33 = vld [vmem:[#allocation6 + $0x4f8] sm:$0xff]  ;;  %v2127_v60 = vld [vmem:[#allocation6 + $0x4e8] sm:$0xff] }
 0x2c8   : > { %3068 = vmatpush3.msra.mxu0 %v2044_v0  ;;  %3103 = vmatpush3.msra.mxu1 %v2076_v6  ;;  %v1865_v39 = vadd.f32 %v1864_v59, %v1863_v23  ;;  %v2160_v23 = vrot.slane %v4974_v2, %v5330_v16  ;;  %v2128_v6 = vld [vmem:[#allocation6 + $0x4f0] sm:$0xff]  ;;  %v2111_v2 = vld [vmem:[#allocation6 + $0x468] sm:$0xff] }
 0x2c9   : > { %v1878_v31 = vadd.f32 %v1877_v11, %v1876_v35  ;;  %3069 = vmatprep.subr.mxu0 %v2059_v30  ;;  %3104 = vmatprep.subr.mxu1 %v2091_v12  ;;  %v2113_v35 = vld [vmem:[#allocation6 + $0x478] sm:$0xff]  ;;  %v2112_v59 = vld [vmem:[#allocation6 + $0x470] sm:$0xff]  ;;  %v5331_v30 = vmov 0.0   ;;  %v2126_v12 = vld [vmem:[#allocation6 + $0x4e0] sm:$0xff] }
 0x2ca   : > { %3070 = vmatpush3.msra.mxu0 %v2043_v47  ;;  %3105 = vmatpush3.msra.mxu1 %v2075_v8  ;;  %v2110_v11 = vld [vmem:[#allocation6 + $0x460] sm:$0xff]  ;;  %v2125_v47 = vld [vmem:[#allocation6 + $0x4d8] sm:$0xff] }
 0x2cb   : > { %v1938_v13 = vcombine.low %v1865_v39, %v1878_v31  ;;  %3071 = vmatprep.subr.mxu0 %v2058_v4  ;;  %3106 = vmatprep.subr.mxu1 %v2090_v52  ;;  %v2109_v8 = vld [vmem:[#allocation6 + $0x458] sm:$0xff]  ;;  %v2108_v4 = vld [vmem:[#allocation6 + $0x450] sm:$0xff]  ;;  %v2123_v52 = vld [vmem:[#allocation6 + $0x4c8] sm:$0xff] }
 0x2cc   : > { %3072 = vmatpush3.msra.mxu0 %v2042_v57  ;;  %3107 = vmatpush3.msra.mxu1 %v2074_v19  ;;  %v2107_v39 = vld [vmem:[#allocation6 + $0x448] sm:$0xff]  ;;  %v2122_v31 = vld [vmem:[#allocation6 + $0x4c0] sm:$0xff]  ;;  %v2121_v19 = vld [vmem:[#allocation6 + $0x4b8] sm:$0xff] }
 0x2cd   : > { %v1945_v14 = vrot.slane %v1938_v13, %v4951_v9  ;;  %3073 = vmatprep.subr.mxu0 %v2057_v40  ;;  %3108 = vmatprep.subr.mxu1 %v2089_v10  ;;  %v2106_v57 = vld [vmem:[#allocation6 + $0x440] sm:$0xff]  ;;  %v2105_v40 = vld [vmem:[#allocation6 + $0x438] sm:$0xff]  ;;  %v2120_v10 = vld [vmem:[#allocation6 + $0x4b0] sm:$0xff] }
 0x2ce   : > { %3074 = vmatpush3.msra.mxu0 %v2041_v37  ;;  %3109 = vmatpush3.msra.mxu1 %v2073_v62  ;;  %v2104_v13 = vld [vmem:[#allocation6 + $0x430] sm:$0xff]  ;;  %v2119_v37 = vld [vmem:[#allocation6 + $0x4a8] sm:$0xff] }
 0x2cf   : > { %v1952_v55 = vrot.slane %v1945_v14, %v4951_v9  ;;  %3075 = vmatprep.subr.mxu0 %v2056_v50  ;;  %3110 = vmatprep.subr.mxu1 %v2088_v36  ;;  %v2037_v9 = vld [vmem:[#allocation6 + $0x218] sm:$0xff]  ;;  %v2103_v62 = vld [vmem:[#allocation6 + $0x428] sm:$0xff]  ;;  %v2118_v50 = vld [vmem:[#allocation6 + $0x4a0] sm:$0xff] }
 0x2d0   : > { %3076 = vmatpush3.msra.mxu0 %v2040_v24  ;;  %3111 = vmatpush3.msra.mxu1 %v2072_v32  ;;  %v2102_v36 = vld [vmem:[#allocation6 + $0x420] sm:$0xff]  ;;  %v2117_v14 = vld [vmem:[#allocation6 + $0x498] sm:$0xff]  ;;  %v2116_v32 = vld [vmem:[#allocation6 + $0x490] sm:$0xff] }
 0x2d1   : > { %v1956_v26 = vadd.f32 %v1952_v55, %v1748_v48  ;;  %3077 = vmatprep.subr.mxu0 %v2055_v22  ;;  %3112 = vmatprep.subr.mxu1 %v2087_v18  ;;  %v2101_v24 = vld [vmem:[#allocation6 + $0x418] sm:$0xff]  ;;  %v2100_v48 = vld [vmem:[#allocation6 + $0x410] sm:$0xff]  ;;  %v2115_v22 = vld [vmem:[#allocation6 + $0x488] sm:$0xff] }
 0x2d2   : > { %3078 = vmatpush3.msra.mxu0 %v2039_v58  ;;  %3113 = vmatpush3.msra.mxu1 %v2071_v51  ;;  %v2099_v18 = vld [vmem:[#allocation6 + $0x408] sm:$0xff]  ;;  %v2114_v55 = vld [vmem:[#allocation6 + $0x480] sm:$0xff] }
 0x2d3   : > { %1962 = vst.msk [vmem:[#allocation2 + $0x8] sm:$0x3] %vm4899_vm1, %v1956_v26  ;;  %3079 = vmatprep.subr.mxu0 %v2054_v25  ;;  %3114 = vmatprep.subr.mxu1 %v2086_v1  ;;  %v2098_v58 = vld [vmem:[#allocation6 + $0x400] sm:$0xff]  ;;  %v2552_v25 = vld [vmem:[#allocation8 + $0x10] sm:$0x3]  ;;  %v2551_v1 = vld [vmem:[#allocation8 + $0x8] sm:$0xff] }
 0x2d4   : > { %3080 = vmatpush3.msra.mxu0 %v2038_v44  ;;  %3115 = vmatpush3.msra.mxu1 %v2070_v45  ;;  %v2550_v26 = vld [vmem:[#allocation8] sm:$0xff]  ;;  %v2548_v45 = vld [vmem:[%s5179_s8 + $0x70] sm:$0xff] }
 0x2d5   : > { %3081 = vmatprep.subr.mxu0 %v2053_v53  ;;  %3116 = vmatprep.subr.mxu1 %v2085_v21  ;;  %v2549_v44 = vld [vmem:[%s5179_s8 + $0x78] sm:$0xff]  ;;  %v2547_v53 = vld [vmem:[%s5179_s8 + $0x68] sm:$0xff]  ;;  %v2546_v21 = vld [vmem:[%s5179_s8 + $0x60] sm:$0xff] }
 0x2d6   : > { %3082 = vmatpush3.msra.mxu0 %v2037_v9  ;;  %3117 = vmatpush3.msra.mxu1 %v2069_v5  ;;  %v2544_v9 = vld [vmem:[%s5179_s8 + $0x50] sm:$0xff]  ;;  %v2543_v5 = vld [vmem:[%s5179_s8 + $0x48] sm:$0xff] }
 0x2d7   : > { %3083 = vmatprep.subr.mxu0 %v2052_v63  ;;  %3118 = vmatprep.subr.mxu1 %v2084_v42  ;;  %v2542_v63 = vld [vmem:[%s5179_s8 + $0x40] sm:$0xff]  ;;  %v2541_v42 = vld [vmem:[%s5179_s8 + $0x38] sm:$0xff] }
 0x2d8   : > { %3084 = vmatpush3.msra.mxu0 %v2036_v3  ;;  %3119 = vmatpush3.msra.mxu1 %v2068_v20  ;;  %v2540_v3 = vld [vmem:[%s5179_s8 + $0x30] sm:$0xff]  ;;  %v2539_v20 = vld [vmem:[%s5179_s8 + $0x28] sm:$0xff] }
 0x2d9   : > { %3085 = vmatprep.subr.mxu0 %v2051_v54  ;;  %3120 = vmatprep.subr.mxu1 %v2083_v61  ;;  %v2538_v54 = vld [vmem:[%s5179_s8 + $0x20] sm:$0xff]  ;;  %v2537_v61 = vld [vmem:[%s5179_s8 + $0x18] sm:$0xff] }
 0x2da   : > { %3086 = vmatpush3.msra.mxu0 %v2035_v15  ;;  %3121 = vmatpush3.msra.mxu1 %v2067_v34  ;;  %v1967_v49 = vld [vmem:[#allocation2 + $0x8] sm:$0x3]  ;;  %v2536_v15 = vld [vmem:[%s5179_s8 + $0x10] sm:$0xff] }
 0x2db   : > { %3087 = vmatprep.subr.mxu0 %v2050_v29  ;;  %3122 = vmatprep.subr.mxu1 %v2082_v27  ;;  %v5005_v43 = vmul.f32 0.015625, %v1967_v49  ;;  %v2535_v34 = vld [vmem:[%s5179_s8 + $0x8] sm:$0xff]  ;;  %v2534_v29 = vld [vmem:[%s5179_s8] sm:$0xff]  ;;  %v2711_v27 = vld [vmem:[%s5182_s11 + $0x38] sm:$0xff] }
 0x2dc   : > { %3088 = vmatpush3.msra.mxu0 %v2034_v38  ;;  %3123 = vmatpush3.msra.mxu1 %v2066_v46  ;;  %v2710_v38 = vld [vmem:[%s5182_s11 + $0x30] sm:$0xff]  ;;  %v2709_v46 = vld [vmem:[%s5182_s11 + $0x28] sm:$0xff]  ;;  %v2708_v49 = vld [vmem:[%s5182_s11 + $0x20] sm:$0xff] }
 0x2dd   : > { %2388 = vmatmul.mubr.f32.vlgmr.msra.gmra.mxu0 %v2152_v28  ;;  %2458 = vmatmul.mubr.f32.vlgmr.msra.gmra.mxu1 %v2160_v23  ;;  %v2172_v0 = vrot.slane %v5005_v43, %v5322_v17  ;;  %v2124_v17 = vld [vmem:[#allocation6 + $0x4d0] sm:$0xff]  ;;  %v2168_v51 = vrot.slane %v5005_v43, %v5324_v56  ;;  %v2533_v56 = vld [vmem:[%s523_s23] sm:$0x1]  ;;  %s3833_s23 = scalar_lea.vmem %s3832_s28, 32 }
 0x2de   : > { %3127 = vmatprep.subr.mxu0 %v2129_v33  ;;  %3204 = vmatprep.subr.mxu1 %v5331_v30  ;;  %v2130_v43 = vld [vmem:[%s5177_s6] sm:$0x1]  ;;  %p3835_p9 = scmp.lt.s32.totalorder %s3833_s23, %s3827_s19 }
 0x2df   : > { %3128 = vmatpush3.msra.mxu0 %v2113_v35  ;;  %2527 = vmatprep.mubr.f32.mxu0 %v2172_v0 }
 0x2e0   : > { %3129 = vmatprep.subr.mxu0 %v2128_v6  ;;  %3205 = vmatpush3.msk.msra.mxu1 %vm2557_vm2, %v2552_v25  ;;  %p3836_p12 = por %p3835_p9, %p3834_p7 }
 0x2e1   : > { %3130 = vmatpush3.msra.mxu0 %v2112_v59  ;;  %3206 = vmatprep.subr.mxu1 %v5331_v30 }
 0x2e2   : > { %3131 = vmatprep.subr.mxu0 %v2127_v60  ;;  %3207 = vmatpush3.msra.mxu1 %v2551_v1  ;;  %p3837_p1 = pnand %p3836_p12, %p3830_p13 }
 0x2e3   : > { %3132 = vmatpush3.msra.mxu0 %v2111_v2  ;;  %3208 = vmatprep.subr.mxu1 %v5331_v30 }
 0x2e4   : > { %3133 = vmatprep.subr.mxu0 %v2126_v12  ;;  %3209 = vmatpush3.msra.mxu1 %v2550_v26 }
 0x2e5   : > { %3134 = vmatpush3.msra.mxu0 %v2110_v11  ;;  %3210 = vmatprep.mubr.msk.f32.mxu1 %vm3923_vm3, %v5331_v30 }
 0x2e6   : > { %3135 = vmatprep.subr.mxu0 %v2125_v47  ;;  %3211 = vmatmul.mubr.msk.f32.vlgmr.msra.gmra.mxu1 %vm2553_vm4, %v2533_v56 }
 0x2e7   : > { %3136 = vmatpush3.msra.mxu0 %v2109_v8  ;;  %3213 = vmatprep.subr.mxu1 %v5331_v30 }
 0x2e8   : > { %3137 = vmatprep.subr.mxu0 %v2124_v17  ;;  %3214 = vmatpush3.msra.mxu1 %v2549_v44 }
 0x2e9   : > { %3138 = vmatpush3.msra.mxu0 %v2108_v4  ;;  %3245 = vmatprep.mubr.msk.f32.mxu1 %vm3923_vm3, %v5331_v30 }
 0x2ea   : > { %3139 = vmatprep.subr.mxu0 %v2123_v52  ;;  %3215 = vmatprep.subr.mxu1 %v5331_v30 }
 0x2eb   : > { %3140 = vmatpush3.msra.mxu0 %v2107_v39  ;;  %3216 = vmatpush3.msra.mxu1 %v2548_v45 }
 0x2ec   : > { %3141 = vmatprep.subr.mxu0 %v2122_v31  ;;  %3217 = vmatprep.subr.mxu1 %v5331_v30 }
 0x2ed   : > { %3142 = vmatpush3.msra.mxu0 %v2106_v57  ;;  %3218 = vmatpush3.msra.mxu1 %v2547_v53 }
 0x2ee   : > { %3143 = vmatprep.subr.mxu0 %v2121_v19  ;;  %3219 = vmatprep.subr.mxu1 %v5331_v30 }
 0x2ef   : > { %3144 = vmatpush3.msra.mxu0 %v2105_v40  ;;  %3220 = vmatpush3.msra.mxu1 %v2546_v21  ;;  %v2707_v40 = vld [vmem:[%s5182_s11 + $0x18] sm:$0xff] }
 0x2f0   : > { %3145 = vmatprep.subr.mxu0 %v2120_v10  ;;  %3221 = vmatprep.subr.mxu1 %v5331_v30  ;;  %v2706_v10 = vld [vmem:[%s5182_s11 + $0x10] sm:$0xff] }
 0x2f1   : > { %3146 = vmatpush3.msra.mxu0 %v2104_v13  ;;  %3222 = vmatpush3.msra.mxu1 %v2545_v7  ;;  %v2705_v13 = vld [vmem:[%s5182_s11 + $0x8] sm:$0xff] }
 0x2f2   : > { %3147 = vmatprep.subr.mxu0 %v2119_v37  ;;  %3223 = vmatprep.subr.mxu1 %v5331_v30  ;;  %v2704_v37 = vld [vmem:[%s5182_s11] sm:$0xff] }
 0x2f3   : > { %3148 = vmatpush3.msra.mxu0 %v2103_v62  ;;  %3224 = vmatpush3.msra.mxu1 %v2544_v9 }
 0x2f4   : > { %3149 = vmatprep.subr.mxu0 %v2118_v50  ;;  %3225 = vmatprep.subr.mxu1 %v5331_v30  ;;  %v2701_v50 = vld [vmem:[%s5181_s10] sm:$0x1] }
 0x2f5   : > { %3150 = vmatpush3.msra.mxu0 %v2102_v36  ;;  %3226 = vmatpush3.msra.mxu1 %v2543_v5 }
 0x2f6   : > { %3151 = vmatprep.subr.mxu0 %v2117_v14  ;;  %3227 = vmatprep.subr.mxu1 %v5331_v30 }
 0x2f7   : > { %3152 = vmatpush3.msra.mxu0 %v2101_v24  ;;  %3228 = vmatpush3.msra.mxu1 %v2542_v63 }
 0x2f8   : > { %3153 = vmatprep.subr.mxu0 %v2116_v32  ;;  %3229 = vmatprep.subr.mxu1 %v5331_v30 }
 0x2f9   : > { %3154 = vmatpush3.msra.mxu0 %v2100_v48  ;;  %3230 = vmatpush3.msra.mxu1 %v2541_v42 }
 0x2fa   : > { %3155 = vmatprep.subr.mxu0 %v2115_v22  ;;  %3231 = vmatprep.subr.mxu1 %v5331_v30 }
 0x2fb   : > { %3156 = vmatpush3.msra.mxu0 %v2099_v18  ;;  %3232 = vmatpush3.msra.mxu1 %v2540_v3 }
 0x2fc   : > { %3157 = vmatprep.subr.mxu0 %v2114_v55  ;;  %3233 = vmatprep.subr.mxu1 %v5331_v30 }
 0x2fd   : > { %3158 = vmatpush3.msra.mxu0 %v2098_v58  ;;  %3234 = vmatpush3.msra.mxu1 %v2539_v20 }
 0x2fe   : > { %2528 = vmatmul.mubr.f32.vlgmr.msra.gmra.mxu0 %v2168_v51  ;;  %3248 = vmatprep.subr.mxu0 %v5331_v30 }
 0x2ff   : > { %3264 = vmatprep.mubr.msk.f32.mxu0 %vm3923_vm3, %v5331_v30  ;;  %3235 = vmatprep.subr.mxu1 %v5331_v30 }
 0x300   : > { %3236 = vmatpush3.msra.mxu1 %v2538_v54  ;;  %3249 = vmatpush3.msra.mxu0 %v2711_v27 }
 0x301   : > { %3237 = vmatprep.subr.mxu1 %v5331_v30  ;;  %3250 = vmatprep.subr.mxu0 %v5331_v30 }
 0x302   : > { %3238 = vmatpush3.msra.mxu1 %v2537_v61  ;;  %3251 = vmatpush3.msra.mxu0 %v2710_v38 }
 0x303   : > { %3239 = vmatprep.subr.mxu1 %v5331_v30  ;;  %3252 = vmatprep.subr.mxu0 %v5331_v30 }
 0x304   : > { %3240 = vmatpush3.msra.mxu1 %v2536_v15  ;;  %3253 = vmatpush3.msra.mxu0 %v2709_v46 }
 0x305   : > { %3241 = vmatprep.subr.mxu1 %v5331_v30  ;;  %3254 = vmatprep.subr.mxu0 %v5331_v30 }
 0x306   : > { %3242 = vmatpush3.msra.mxu1 %v2535_v34  ;;  %3255 = vmatpush3.msra.mxu0 %v2708_v49 }
 0x307   : > { %3243 = vmatprep.subr.mxu1 %v5331_v30  ;;  %3256 = vmatprep.subr.mxu0 %v5331_v30 }
 0x308   : > { %3244 = vmatpush3.msra.mxu1 %v2534_v29  ;;  %3257 = vmatpush3.msra.mxu0 %v2707_v40 }
 0x309   : > { %3258 = vmatprep.subr.mxu0 %v5331_v30 }
 0x30a   : > { %3259 = vmatpush3.msra.mxu0 %v2706_v10 }
 0x30b   : > { %3260 = vmatprep.subr.mxu0 %v5331_v30 }
 0x30c   : > { %3261 = vmatpush3.msra.mxu0 %v2705_v13 }
 0x30d   : > { %3262 = vmatprep.subr.mxu0 %v5331_v30  ;;  %v2712_v30 = vld [vmem:[%s5183_s12] sm:$0x1] }
 0x30e   : > { %3263 = vmatpush3.msra.mxu0 %v2704_v37 }
 0x37c   : > { %v3019_v41 = vpop.f32.mrf.mxu0  ;;  %v3054_v16 = vpop.f32.mrf.mxu1 }
 0x37e   : > { %v3020_v28 = vpop.f32.mrf.mxu0  ;;  %v3055_v35 = vpop.f32.mrf.mxu1 }
 0x37f   : > { %v3021_v33 = vadd.f32 %v3020_v28, %v3019_v41  ;;  %v3056_v60 = vadd.f32 %v3055_v35, %v3054_v16 }
 0x381   : > { %v2250_v6 = vadd.f32 %v3021_v33, %v2130_v43 }
 0x383   : > { %v2320_v12 = vadd.f32 %v3056_v60, %v2250_v6 }
 0x39d   : > { %v3089_v23 = vpop.f32.mrf.mxu0  ;;  %v3124_v59 = vpop.f32.mrf.mxu1 }
 0x39f   : > { %v3090_v0 = vpop.f32.mrf.mxu0  ;;  %v3125_v11 = vpop.f32.mrf.mxu1 }
 0x3a0   : > { %v3091_v2 = vadd.f32 %v3090_v0, %v3089_v23  ;;  %v3126_v17 = vadd.f32 %v3125_v11, %v3124_v59 }
 0x3a2   : > { %v2390_v47 = vadd.f32 %v3091_v2, %v2320_v12 }
 0x3a4   : > { %v2460_v52 = vadd.f32 %v3126_v17, %v2390_v47 }
 0x3a6   : > { %v2627_v57 = vpop.f32.mrf.mxu1 }
 0x3a8   : > { %v3212_v19 = vpop.f32.mrf.mxu1 }
 0x3be   : > { %v3159_v8 = vpop.f32.mrf.mxu0 }
 0x3c0   : > { %v3160_v4 = vpop.f32.mrf.mxu0 }
 0x3c1   : > { %v3161_v39 = vadd.f32 %v3160_v4, %v3159_v8 }
 0x3c3   : > { %v2530_v31 = vadd.f32 %v3161_v39, %v2460_v52 }
 0x3c5   : > { %3246 = vmatmul.mubr.f32.vlgmr.msra.gmra.mxu1 %v2530_v31 }
 0x485   : > { %v2697_v62 = vpop.f32.mrf.mxu1 }
 0x486   : > { %v2698_v36 = vadd.f32 %v2697_v62, %v2627_v57 }
 0x487   : > { %v3247_v14 = vpop.f32.mrf.mxu1 }
 0x488   : > { %v2702_v24 = vadd.f32 %v2701_v50, %v2698_v36 }
 0x48a   : > { %v2703_v32 = vmax.f32 %v2702_v24, 0.0 }
 0x48c   : > { %3265 = vmatmul.mubr.msk.f32.vlgmr.msra.gmra.mxu0 %vm2713_vm5, %v2703_v32 }
 0x54c   : > { %v2783_v48 = vpop.f32.mrf.mxu0 }
 0x54d   : > { %v2784_v22 = vadd.f32 %v2783_v48, %v2712_v30 }
 0x54e   : > { %v3266_v18 = vpop.f32.mrf.mxu0 }
 0x54f   : > { %2787 = vst [vmem:[%s510_s20] sm:$0x1] %v2784_v22 }
 0x550   : > { %3840 = shalt.err (!%p3837_p1)
}
 0x551   : > { %s3841_s21 = scalar_lea.hbm %s5131_s29, 16  ;;  %s3845_s17 = scalar_lea.hbm %s5184_s13, 32 }
 0x552   : > { %p3842_p2 = scmp.ne.s32.totalorder %s5131_s29, %s3841_s21  ;;  %p3846_p6 = scmp.lt.s32.totalorder %s5131_s29, %s5184_s13 }
 0x553   : > { %p3847_p0 = scmp.lt.s32.totalorder %s3845_s17, %s3841_s21 }
 0x554   : > { %p3843_p3 = pnand %p3842_p2, %p4035_p4 }
 0x555   : > { %p3848_p10 = por %p3847_p0, %p3846_p6 }
 0x556   : > { %p3844_p5 = pneg %p3843_p3 }
 0x558   : > { %p3849_p11 = pnand %p3848_p10, %p3844_p5 }
 0x55a   : > { %3852 = shalt.err (!%p3849_p11)
}
 0x55b   : > { %3279 = dma.vmem_to_hbm [thread:$0]  (%p4035_p4), %s2802_s27, 16, %s5131_s29, %s2789_s22  }
 0x55c PF: > { %s5332_s16 = sld [smem:[#allocation13_spill]]  ;;  %p3301_p13 = scmp.ge.s32.totalorder %s3911_s30, 2 }
 0x55e   : > { %p3292_p7 = pnand %p3301_p13, %p4042_p8 }
 0x560   : > { %p3293_p9 = pneg %p3292_p7 }
 0x562   : > { %s2813_s24 = sand.u32 1, %s5332_s16  }
 0x563   : > { %s2814_s28 = scalar_lea.sflag [#allocation5], %s2813_s24 }
 0x564   : > { %3886 = dma.done.wait (%p3293_p9), %s2814_s28, 16  }
 0x565   : > { %3888 = vsyncadd (%p3293_p9), %s2814_s28, 4294967280  ;;  %s28_s30 = sadd.s32 1, %s3911_s30   ;;  %s5334_s23 = sld [smem:[#allocation14_spill]] }
 0x566   : > { %p25_p12 = scmp.ge.s32.totalorder %s28_s30, 4   ;;  %s5335_s27 = sld [smem:[#allocation18_spill]] }
 0x567   : > { %s5336_s28 = sld [smem:[#allocation15_spill]]  ;;  %s5338_s25 = smov %s3895_s26 }
 0x568   : > { %s5337_s29 = sld [smem:[#allocation16_spill]]  ;;  %27 = sbr.rel (!%p25_p12) target bundleno = 6 (0x6), region = 131 }
 0x56b   : > { %s5339_s26 = smov %s5334_s23 }
 0x56d   :  { %2818 = vsyncpa [#allocation4], 1 }
 0x56e   :  { %2820 = vsyncpa [#allocation4 + $0x1], 1 }
 0x56f   :  { %2821 = vsyncpa [#allocation7], 1 }
 0x570   :  { %2822 = vsyncpa [#allocation5], 1 }
 0x571   :  { %2824 = vsyncpa [#allocation5 + $0x1], 1 }

</bundles_post_ra>
